<compile_context>
chip_gen: v7x
topology: tpu7x:2x2x1
jax: 0.10.0
libtpu: 0.0.40
codegen_flags: <defaults>
</compile_context>

<pallas_src>
import functools
import math

import numpy as np
import jax
import jax.numpy as jnp
from jax import lax
from jax.experimental import pallas as pl
from jax.experimental.pallas import tpu as pltpu

VMEM = pltpu.MemorySpace.VMEM

_STREAM_PARAM_ORDER = ('conv_w', 'conv_b', 'wqkv', 'bqkv', 'wo', 'bo',
                       'g1', 'b1', 'wf1', 'bf1', 'wf2', 'bf2', 'g2', 'b2')


# ----------------------- fused per-stream kernel ---------------------------

def _stream_kernel(x_ref, bias_ref, cw_ref, cb_ref,
                   wqkv_ref, bqkv_ref, wo_ref, bo_ref,
                   g1_ref, b1_ref, wf1_ref, bf1_ref, wf2_ref, bf2_ref,
                   g2_ref, b2_ref, o_ref, *, n_layers, n_head, eps):
    """One grid step == one stream.  Everything stays in VMEM."""
    BL, E = o_ref.shape
    Dh = E // n_head
    scale = 1.0 / math.sqrt(Dh)

    bias = bias_ref[...]                                   # (BL, BL) additive cross-batch mask

    # Conv1d(1->E) as a matmul on pre-unfolded windows: (B*L, K) @ (K, E) + (1, E)
    h = jnp.dot(x_ref[...], cw_ref[...], preferred_element_type=jnp.float32) + cb_ref[...]

    for li in range(n_layers):
        # ---- self attention (post-norm TransformerEncoderLayer, eval mode) ----
        qkv = jnp.dot(h, wqkv_ref[li], preferred_element_type=jnp.float32) + bqkv_ref[li]
        q = qkv[:, 0 * E:1 * E]
        k = qkv[:, 1 * E:2 * E]
        v = qkv[:, 2 * E:3 * E]
        heads = []
        for hh in range(n_head):                            # static unroll over heads
            lo, hi = hh * Dh, (hh + 1) * Dh
            qh, kh, vh = q[:, lo:hi], k[:, lo:hi], v[:, lo:hi]
            s = lax.dot_general(qh, kh, (((1,), (1,)), ((), ())),
                                preferred_element_type=jnp.float32) * scale
            s = s + bias                                    # -1e30 on cross-batch pairs
            s = s - jnp.max(s, axis=-1, keepdims=True)
            p = jnp.exp(s)
            p = p * pl.reciprocal(jnp.sum(p, axis=-1, keepdims=True), approx=True)
            heads.append(jnp.dot(p, vh, preferred_element_type=jnp.float32))
        attn = jnp.concatenate(heads, axis=-1)
        attn = jnp.dot(attn, wo_ref[li], preferred_element_type=jnp.float32) + bo_ref[li]

        # ---- residual + LayerNorm1 ----
        h1 = h + attn
        mu = jnp.mean(h1, axis=-1, keepdims=True)
        var = jnp.mean(jnp.square(h1 - mu), axis=-1, keepdims=True)
        h1 = (h1 - mu) * lax.rsqrt(var + eps) * g1_ref[li] + b1_ref[li]

        # ---- FFN: Linear -> ReLU -> Linear ----
        ff = jnp.dot(h1, wf1_ref[li], preferred_element_type=jnp.float32) + bf1_ref[li]
        ff = jnp.maximum(ff, 0.0)
        ff = jnp.dot(ff, wf2_ref[li], preferred_element_type=jnp.float32) + bf2_ref[li]

        # ---- residual + LayerNorm2 ----
        h2 = h1 + ff
        mu = jnp.mean(h2, axis=-1, keepdims=True)
        var = jnp.mean(jnp.square(h2 - mu), axis=-1, keepdims=True)
        h = (h2 - mu) * lax.rsqrt(var + eps) * g2_ref[li] + b2_ref[li]

    o_ref[...] = h


def run_streams(xs, attn_bias, sp, *, n_head, eps=1e-5):
    """xs: (S, B*L, K) unfolded windows.  sp: params stacked over the stream axis."""
    S, BL, K = xs.shape
    E = sp['conv_w'].shape[-1]
    n_layers = sp['wqkv'].shape[1]

    def stream_spec(arr):
        nd = arr.ndim - 1
        return pl.BlockSpec((None,) + tuple(arr.shape[1:]),
                            lambda s, _z=(0,) * nd: (s,) + _z)

    args = [xs, attn_bias] + [sp[k] for k in _STREAM_PARAM_ORDER]
    in_specs = ([stream_spec(xs),
                 pl.BlockSpec((BL, BL), lambda s: (0, 0))]
                + [stream_spec(sp[k]) for k in _STREAM_PARAM_ORDER])

    return pl.pallas_call(
        functools.partial(_stream_kernel, n_layers=n_layers, n_head=n_head, eps=eps),
        grid=(S,),
        out_shape=jax.ShapeDtypeStruct((S, BL, E), jnp.float32),
        in_specs=in_specs,
        out_specs=pl.BlockSpec((None, BL, E), lambda s: (s, 0, 0)),
        compiler_params=pltpu.CompilerParams(dimension_semantics=("parallel",)),
    )(*args)


# --------------------------- fused head MLP --------------------------------

def _mlp_kernel(*refs, acts):
    x_ref = refs[0]
    o_ref = refs[-1]
    wb = refs[1:-1]
    h = x_ref[...]
    for i, act in enumerate(acts):
        h = jnp.dot(h, wb[2 * i][...], preferred_element_type=jnp.float32) + wb[2 * i + 1][...]
        if act:
            h = jnp.maximum(h, 0.0)
    o_ref[...] = h


def head_mlp(x, mlp_params):
    n = len(mlp_params)
    acts = tuple([False] + [True] * (n - 2) + [False])      # Linear, [Linear+ReLU]*, Linear
    flat = []
    for lyr in mlp_params:
        flat += [lyr['w'], lyr['b']]
    B = x.shape[0]
    return pl.pallas_call(
        functools.partial(_mlp_kernel, acts=acts),
        out_shape=jax.ShapeDtypeStruct((B, 1), jnp.float32),
        in_specs=[pl.BlockSpec(memory_space=VMEM)] * (1 + len(flat)),
        out_specs=pl.BlockSpec(memory_space=VMEM),
    )(x, *flat)


# ------------------------------ glue / model -------------------------------

def unfold(x, kernel_size, stride):
    """(B, W) -> (B, L, K) conv windows.  Free reshape when stride == kernel_size."""
    B, W = x.shape
    L = (W - kernel_size) // stride + 1
    if stride == kernel_size:
        return x[:, :L * kernel_size].reshape(B, L, kernel_size)
    idx = jnp.arange(L)[:, None] * stride + jnp.arange(kernel_size)[None, :]
    return x[:, idx]                                        # overlapping-window fallback (glue)


def _attn_bias(B, L):
    same = np.kron(np.eye(B, dtype=np.float32), np.ones((L, L), dtype=np.float32))
    return jnp.asarray(np.where(same > 0.5, 0.0, -1e30).astype(np.float32))


def tmodel_forward(params, x, *, r_dim, vix_dim, kernel_size, stride, n_head):
    B = x.shape[0]
    r1 = x[:, :r_dim]
    r2 = x[:, r_dim:2 * r_dim]
    # t = x[:, 2*r_dim:3*r_dim]   # extracted but never used in the PyTorch forward
    vix = x[:, 3 * r_dim:]

    rL = (r_dim - kernel_size) // stride + 1
    vL = (vix_dim - kernel_size) // stride + 1
    K = kernel_size

    r1w = unfold(r1, K, stride).reshape(B * rL, K)
    r2w = unfold(r2, K, stride).reshape(B * rL, K)
    vxw = unfold(vix, K, stride).reshape(B * vL, K)

    sp = params['streams']                                   # stacked (r1, r2, vix)
    E = sp['conv_w'].shape[-1]

    if rL == vL:
        xs = jnp.stack([r1w, r2w, vxw], axis=0)              # (3, B*L, K)
        out = run_streams(xs, _attn_bias(B, rL), sp, n_head=n_head)
        combined = out.reshape(3, B, rL, E).transpose(1, 0, 2, 3).reshape(B, -1)
    else:
        take = lambda t, sl: jax.tree_util.tree_map(lambda a: a[sl], t)
        r_out = run_streams(jnp.stack([r1w, r2w], axis=0), _attn_bias(B, rL),
                            take(sp, slice(0, 2)), n_head=n_head)
        v_out = run_streams(vxw[None], _attn_bias(B, vL),
                            take(sp, slice(2, 3)), n_head=n_head)
        combined = jnp.concatenate(
            [r_out.reshape(2, B, rL, E).transpose(1, 0, 2, 3).reshape(B, -1),
             v_out.reshape(B, vL * E)], axis=1)

    return head_mlp(combined, params['mlp'])


# ----------------------------- parameter init ------------------------------

def _dense_t(key, n_in, n_out):
    """Weights directly in pre-transposed (in, out) layout; bias (1, out)."""
    k1, k2 = jax.random.split(key)
    w = 0.05 * jax.random.normal(k1, (n_in, n_out), jnp.float32)
    b = 0.01 * jax.random.normal(k2, (1, n_out), jnp.float32)
    return w, b


def _init_stream(key, n_layers, K, E, d_ff):
    keys = jax.random.split(key, n_layers + 1)
    conv_w, conv_b = _dense_t(keys[0], K, E)                 # torch (E,1,K) -> (K,E)
    layers = []
    for li in range(n_layers):
        lk = jax.random.split(keys[li + 1], 4)
        wqkv, bqkv = _dense_t(lk[0], E, 3 * E)
        wo, bo = _dense_t(lk[1], E, E)
        wf1, bf1 = _dense_t(lk[2], E, d_ff)
        wf2, bf2 = _dense_t(lk[3], d_ff, E)
        layers.append(dict(
            wqkv=wqkv, bqkv=bqkv, wo=wo, bo=bo,
            wf1=wf1, bf1=bf1, wf2=wf2, bf2=bf2,
            g1=jnp.ones((1, E), jnp.float32), b1=jnp.zeros((1, E), jnp.float32),
            g2=jnp.ones((1, E), jnp.float32), b2=jnp.zeros((1, E), jnp.float32)))
    stacked = jax.tree_util.tree_map(lambda *xs: jnp.stack(xs, 0), *layers)
    return dict(conv_w=conv_w, conv_b=conv_b, **stacked)


def init_params(key, r_dim, vix_dim, n_layers, kernel_size, stride, emb, n_head,
                mlp_dims, d_ff=2048):
    k_streams, k_mlp = jax.random.split(key)
    skeys = jax.random.split(k_streams, 3)                   # r1, r2, vix
    streams = [_init_stream(k, n_layers, kernel_size, emb, d_ff) for k in skeys]
    streams = jax.tree_util.tree_map(lambda *xs: jnp.stack(xs, 0), *streams)

    rL = (r_dim - kernel_size) // stride + 1
    vL = (vix_dim - kernel_size) // stride + 1
    dims = [(2 * rL + vL) * emb] + list(mlp_dims) + [1]
    mkeys = jax.random.split(k_mlp, len(dims) - 1)
    mlp = []
    for i in range(len(dims) - 1):
        w, b = _dense_t(mkeys[i], dims[i], dims[i + 1])
        mlp.append({'w': w, 'b': b})

    # NOTE: vix_t_mlp / r1_t_mlp / r2_t_mlp from __init__ are never used in forward(),
    # so they are intentionally not instantiated here.
    return {'streams': streams, 'mlp': mlp}


# --------------------------------- main -------------------------------------

if __name__ == "__main__":
    r_dim, vix_dim = 16, 16
    n_transformer_layers = 1
    kernel_size, stride = 4, 4
    embedding_dim, n_head = 32, 4
    mlp_dims = [64, 32]

    key = jax.random.PRNGKey(0)
    pkey, xkey = jax.random.split(key)
    params = init_params(pkey, r_dim, vix_dim, n_transformer_layers,
                         kernel_size, stride, embedding_dim, n_head, mlp_dims)

    batch = 2
    x = jax.random.normal(xkey, (batch, 3 * r_dim + vix_dim), jnp.float32)

    fwd = jax.jit(functools.partial(
        tmodel_forward, r_dim=r_dim, vix_dim=vix_dim, kernel_size=kernel_size,
        stride=stride, n_head=n_head))

    out = fwd(params, x)
    jax.block_until_ready(out)
    assert out.shape == (batch, 1), out.shape
    print("KERNEL_OK")
</pallas_src>

<mosaic_0001>
module attributes {stable_mosaic.version = 11 : i64} {
  func.func @_stream_kernel(%arg0: i32, %arg1: memref<1x8x4xf32, #tpu.memory_space<vmem>>, %arg2: memref<8x8xf32, #tpu.memory_space<vmem>>, %arg3: memref<1x4x32xf32, #tpu.memory_space<vmem>>, %arg4: memref<1x1x32xf32, #tpu.memory_space<vmem>>, %arg5: memref<1x1x32x96xf32, #tpu.memory_space<vmem>>, %arg6: memref<1x1x1x96xf32, #tpu.memory_space<vmem>>, %arg7: memref<1x1x32x32xf32, #tpu.memory_space<vmem>>, %arg8: memref<1x1x1x32xf32, #tpu.memory_space<vmem>>, %arg9: memref<1x1x1x32xf32, #tpu.memory_space<vmem>>, %arg10: memref<1x1x1x32xf32, #tpu.memory_space<vmem>>, %arg11: memref<1x1x32x2048xf32, #tpu.memory_space<vmem>>, %arg12: memref<1x1x1x2048xf32, #tpu.memory_space<vmem>>, %arg13: memref<1x1x2048x32xf32, #tpu.memory_space<vmem>>, %arg14: memref<1x1x1x32xf32, #tpu.memory_space<vmem>>, %arg15: memref<1x1x1x32xf32, #tpu.memory_space<vmem>>, %arg16: memref<1x1x1x32xf32, #tpu.memory_space<vmem>>, %arg17: memref<1x8x32xf32, #tpu.memory_space<vmem>>) attributes {dimension_semantics = [#tpu.dimension_semantics<parallel>], iteration_bounds = array<i64: 3>, scalar_prefetch = 0 : i64, scratch_operands = 0 : i64, tpu.core_type = #tpu.core_type<tc>, window_params = [{transform_indices = @transform_0, window_bounds = array<i64: 1, 8, 4>}, {pipeline_mode = #tpu.pipeline_mode<synchronous>, transform_indices = @transform_1, window_bounds = array<i64: 8, 8>}, {transform_indices = @transform_2, window_bounds = array<i64: 1, 4, 32>}, {transform_indices = @transform_3, window_bounds = array<i64: 1, 1, 32>}, {transform_indices = @transform_4, window_bounds = array<i64: 1, 1, 32, 96>}, {transform_indices = @transform_5, window_bounds = array<i64: 1, 1, 1, 96>}, {transform_indices = @transform_6, window_bounds = array<i64: 1, 1, 32, 32>}, {transform_indices = @transform_7, window_bounds = array<i64: 1, 1, 1, 32>}, {transform_indices = @transform_8, window_bounds = array<i64: 1, 1, 1, 32>}, {transform_indices = @transform_9, window_bounds = array<i64: 1, 1, 1, 32>}, {transform_indices = @transform_10, window_bounds = array<i64: 1, 1, 32, 2048>}, {transform_indices = @transform_11, window_bounds = array<i64: 1, 1, 1, 2048>}, {transform_indices = @transform_12, window_bounds = array<i64: 1, 1, 2048, 32>}, {transform_indices = @transform_13, window_bounds = array<i64: 1, 1, 1, 32>}, {transform_indices = @transform_14, window_bounds = array<i64: 1, 1, 1, 32>}, {transform_indices = @transform_15, window_bounds = array<i64: 1, 1, 1, 32>}, {transform_indices = @transform_16, window_bounds = array<i64: 1, 8, 32>}]} {
    %c0 = arith.constant 0 : index
    %c0_0 = arith.constant 0 : index
    %0 = vector.load %arg2[%c0, %c0_0] : memref<8x8xf32, #tpu.memory_space<vmem>>, vector<8x8xf32>
    %c0_1 = arith.constant 0 : index
    %c0_2 = arith.constant 0 : index
    %c0_3 = arith.constant 0 : index
    %1 = vector.load %arg1[%c0_1, %c0_2, %c0_3] : memref<1x8x4xf32, #tpu.memory_space<vmem>>, vector<1x8x4xf32>
    %2 = vector.shape_cast %1 : vector<1x8x4xf32> to vector<8x4xf32>
    %c0_4 = arith.constant 0 : index
    %c0_5 = arith.constant 0 : index
    %c0_6 = arith.constant 0 : index
    %3 = vector.load %arg3[%c0_4, %c0_5, %c0_6] : memref<1x4x32xf32, #tpu.memory_space<vmem>>, vector<1x4x32xf32>
    %4 = vector.shape_cast %3 : vector<1x4x32xf32> to vector<4x32xf32>
    %cst = arith.constant dense<0.000000e+00> : vector<8x32xf32>
    %5 = tpu.matmul %2, %4, %cst {dimension_numbers = #tpu.dot_dimension_numbers<[1], [0], [0], [1], [0, 0, 1, 1], [], []>} : vector<8x4xf32>, vector<4x32xf32>, vector<8x32xf32> -> vector<8x32xf32>
    %c0_7 = arith.constant 0 : index
    %c0_8 = arith.constant 0 : index
    %c0_9 = arith.constant 0 : index
    %6 = vector.load %arg4[%c0_7, %c0_8, %c0_9] : memref<1x1x32xf32, #tpu.memory_space<vmem>>, vector<1x1x32xf32>
    %7 = vector.shape_cast %6 : vector<1x1x32xf32> to vector<1x32xf32>
    %8 = vector.broadcast %7 : vector<1x32xf32> to vector<8x32xf32>
    %9 = arith.addf %5, %8 : vector<8x32xf32>
    %c0_10 = arith.constant 0 : index
    %c0_11 = arith.constant 0 : index
    %c0_12 = arith.constant 0 : index
    %c0_13 = arith.constant 0 : index
    %10 = vector.load %arg5[%c0_10, %c0_11, %c0_12, %c0_13] : memref<1x1x32x96xf32, #tpu.memory_space<vmem>>, vector<1x1x32x96xf32>
    %11 = vector.shape_cast %10 : vector<1x1x32x96xf32> to vector<32x96xf32>
    %cst_14 = arith.constant dense<0.000000e+00> : vector<8x96xf32>
    %12 = tpu.matmul %9, %11, %cst_14 {dimension_numbers = #tpu.dot_dimension_numbers<[1], [0], [0], [1], [0, 0, 1, 1], [], []>} : vector<8x32xf32>, vector<32x96xf32>, vector<8x96xf32> -> vector<8x96xf32>
    %c0_15 = arith.constant 0 : index
    %c0_16 = arith.constant 0 : index
    %c0_17 = arith.constant 0 : index
    %c0_18 = arith.constant 0 : index
    %13 = vector.load %arg6[%c0_15, %c0_16, %c0_17, %c0_18] : memref<1x1x1x96xf32, #tpu.memory_space<vmem>>, vector<1x1x1x96xf32>
    %14 = vector.shape_cast %13 : vector<1x1x1x96xf32> to vector<1x96xf32>
    %15 = vector.broadcast %14 : vector<1x96xf32> to vector<8x96xf32>
    %16 = arith.addf %12, %15 : vector<8x96xf32>
    %17 = vector.extract_strided_slice %16 {offsets = [0, 0], sizes = [8, 32], strides = [1, 1]} : vector<8x96xf32> to vector<8x32xf32>
    %18 = vector.extract_strided_slice %16 {offsets = [0, 32], sizes = [8, 32], strides = [1, 1]} : vector<8x96xf32> to vector<8x32xf32>
    %19 = vector.extract_strided_slice %16 {offsets = [0, 64], sizes = [8, 32], strides = [1, 1]} : vector<8x96xf32> to vector<8x32xf32>
    %20 = vector.extract_strided_slice %17 {offsets = [0, 0], sizes = [8, 8], strides = [1, 1]} : vector<8x32xf32> to vector<8x8xf32>
    %21 = vector.extract_strided_slice %18 {offsets = [0, 0], sizes = [8, 8], strides = [1, 1]} : vector<8x32xf32> to vector<8x8xf32>
    %22 = vector.extract_strided_slice %19 {offsets = [0, 0], sizes = [8, 8], strides = [1, 1]} : vector<8x32xf32> to vector<8x8xf32>
    %cst_19 = arith.constant dense<0.000000e+00> : vector<8x8xf32>
    %23 = tpu.matmul %20, %21, %cst_19 {dimension_numbers = #tpu.dot_dimension_numbers<[1], [1], [0], [0], [0, 0, 1, 0], [], []>} : vector<8x8xf32>, vector<8x8xf32>, vector<8x8xf32> -> vector<8x8xf32>
    %cst_20 = arith.constant 0.353553385 : f32
    %24 = vector.broadcast %cst_20 : f32 to vector<8x8xf32>
    %25 = arith.mulf %23, %24 : vector<8x8xf32>
    %26 = arith.addf %25, %0 : vector<8x8xf32>
    %cst_21 = arith.constant dense<0xFF800000> : vector<8xf32>
    %27 = vector.multi_reduction <maximumf>, %26, %cst_21 [1] : vector<8x8xf32> to vector<8xf32>
    %28 = vector.shape_cast %27 : vector<8xf32> to vector<8x1xf32>
    %29 = vector.broadcast %28 : vector<8x1xf32> to vector<8x8xf32>
    %30 = arith.subf %26, %29 : vector<8x8xf32>
    %31 = math.exp %30 : vector<8x8xf32>
    %cst_22 = arith.constant dense<0.000000e+00> : vector<8xf32>
    %32 = vector.multi_reduction <add>, %31, %cst_22 [1] : vector<8x8xf32> to vector<8xf32>
    %33 = vector.shape_cast %32 : vector<8xf32> to vector<8x1xf32>
    %34 = tpu.reciprocal %33 {approx = true} : vector<8x1xf32> -> vector<8x1xf32>
    %35 = vector.broadcast %34 : vector<8x1xf32> to vector<8x8xf32>
    %36 = arith.mulf %31, %35 : vector<8x8xf32>
    %cst_23 = arith.constant dense<0.000000e+00> : vector<8x8xf32>
    %37 = tpu.matmul %36, %22, %cst_23 {dimension_numbers = #tpu.dot_dimension_numbers<[1], [0], [0], [1], [0, 0, 1, 1], [], []>} : vector<8x8xf32>, vector<8x8xf32>, vector<8x8xf32> -> vector<8x8xf32>
    %38 = vector.extract_strided_slice %17 {offsets = [0, 8], sizes = [8, 8], strides = [1, 1]} : vector<8x32xf32> to vector<8x8xf32>
    %39 = vector.extract_strided_slice %18 {offsets = [0, 8], sizes = [8, 8], strides = [1, 1]} : vector<8x32xf32> to vector<8x8xf32>
    %40 = vector.extract_strided_slice %19 {offsets = [0, 8], sizes = [8, 8], strides = [1, 1]} : vector<8x32xf32> to vector<8x8xf32>
    %cst_24 = arith.constant dense<0.000000e+00> : vector<8x8xf32>
    %41 = tpu.matmul %38, %39, %cst_24 {dimension_numbers = #tpu.dot_dimension_numbers<[1], [1], [0], [0], [0, 0, 1, 0], [], []>} : vector<8x8xf32>, vector<8x8xf32>, vector<8x8xf32> -> vector<8x8xf32>
    %cst_25 = arith.constant 0.353553385 : f32
    %42 = vector.broadcast %cst_25 : f32 to vector<8x8xf32>
    %43 = arith.mulf %41, %42 : vector<8x8xf32>
    %44 = arith.addf %43, %0 : vector<8x8xf32>
    %cst_26 = arith.constant dense<0xFF800000> : vector<8xf32>
    %45 = vector.multi_reduction <maximumf>, %44, %cst_26 [1] : vector<8x8xf32> to vector<8xf32>
    %46 = vector.shape_cast %45 : vector<8xf32> to vector<8x1xf32>
    %47 = vector.broadcast %46 : vector<8x1xf32> to vector<8x8xf32>
    %48 = arith.subf %44, %47 : vector<8x8xf32>
    %49 = math.exp %48 : vector<8x8xf32>
    %cst_27 = arith.constant dense<0.000000e+00> : vector<8xf32>
    %50 = vector.multi_reduction <add>, %49, %cst_27 [1] : vector<8x8xf32> to vector<8xf32>
    %51 = vector.shape_cast %50 : vector<8xf32> to vector<8x1xf32>
    %52 = tpu.reciprocal %51 {approx = true} : vector<8x1xf32> -> vector<8x1xf32>
    %53 = vector.broadcast %52 : vector<8x1xf32> to vector<8x8xf32>
    %54 = arith.mulf %49, %53 : vector<8x8xf32>
    %cst_28 = arith.constant dense<0.000000e+00> : vector<8x8xf32>
    %55 = tpu.matmul %54, %40, %cst_28 {dimension_numbers = #tpu.dot_dimension_numbers<[1], [0], [0], [1], [0, 0, 1, 1], [], []>} : vector<8x8xf32>, vector<8x8xf32>, vector<8x8xf32> -> vector<8x8xf32>
    %56 = vector.extract_strided_slice %17 {offsets = [0, 16], sizes = [8, 8], strides = [1, 1]} : vector<8x32xf32> to vector<8x8xf32>
    %57 = vector.extract_strided_slice %18 {offsets = [0, 16], sizes = [8, 8], strides = [1, 1]} : vector<8x32xf32> to vector<8x8xf32>
    %58 = vector.extract_strided_slice %19 {offsets = [0, 16], sizes = [8, 8], strides = [1, 1]} : vector<8x32xf32> to vector<8x8xf32>
    %cst_29 = arith.constant dense<0.000000e+00> : vector<8x8xf32>
    %59 = tpu.matmul %56, %57, %cst_29 {dimension_numbers = #tpu.dot_dimension_numbers<[1], [1], [0], [0], [0, 0, 1, 0], [], []>} : vector<8x8xf32>, vector<8x8xf32>, vector<8x8xf32> -> vector<8x8xf32>
    %cst_30 = arith.constant 0.353553385 : f32
    %60 = vector.broadcast %cst_30 : f32 to vector<8x8xf32>
    %61 = arith.mulf %59, %60 : vector<8x8xf32>
    %62 = arith.addf %61, %0 : vector<8x8xf32>
    %cst_31 = arith.constant dense<0xFF800000> : vector<8xf32>
    %63 = vector.multi_reduction <maximumf>, %62, %cst_31 [1] : vector<8x8xf32> to vector<8xf32>
    %64 = vector.shape_cast %63 : vector<8xf32> to vector<8x1xf32>
    %65 = vector.broadcast %64 : vector<8x1xf32> to vector<8x8xf32>
    %66 = arith.subf %62, %65 : vector<8x8xf32>
    %67 = math.exp %66 : vector<8x8xf32>
    %cst_32 = arith.constant dense<0.000000e+00> : vector<8xf32>
    %68 = vector.multi_reduction <add>, %67, %cst_32 [1] : vector<8x8xf32> to vector<8xf32>
    %69 = vector.shape_cast %68 : vector<8xf32> to vector<8x1xf32>
    %70 = tpu.reciprocal %69 {approx = true} : vector<8x1xf32> -> vector<8x1xf32>
    %71 = vector.broadcast %70 : vector<8x1xf32> to vector<8x8xf32>
    %72 = arith.mulf %67, %71 : vector<8x8xf32>
    %cst_33 = arith.constant dense<0.000000e+00> : vector<8x8xf32>
    %73 = tpu.matmul %72, %58, %cst_33 {dimension_numbers = #tpu.dot_dimension_numbers<[1], [0], [0], [1], [0, 0, 1, 1], [], []>} : vector<8x8xf32>, vector<8x8xf32>, vector<8x8xf32> -> vector<8x8xf32>
    %74 = vector.extract_strided_slice %17 {offsets = [0, 24], sizes = [8, 8], strides = [1, 1]} : vector<8x32xf32> to vector<8x8xf32>
    %75 = vector.extract_strided_slice %18 {offsets = [0, 24], sizes = [8, 8], strides = [1, 1]} : vector<8x32xf32> to vector<8x8xf32>
    %76 = vector.extract_strided_slice %19 {offsets = [0, 24], sizes = [8, 8], strides = [1, 1]} : vector<8x32xf32> to vector<8x8xf32>
    %cst_34 = arith.constant dense<0.000000e+00> : vector<8x8xf32>
    %77 = tpu.matmul %74, %75, %cst_34 {dimension_numbers = #tpu.dot_dimension_numbers<[1], [1], [0], [0], [0, 0, 1, 0], [], []>} : vector<8x8xf32>, vector<8x8xf32>, vector<8x8xf32> -> vector<8x8xf32>
    %cst_35 = arith.constant 0.353553385 : f32
    %78 = vector.broadcast %cst_35 : f32 to vector<8x8xf32>
    %79 = arith.mulf %77, %78 : vector<8x8xf32>
    %80 = arith.addf %79, %0 : vector<8x8xf32>
    %cst_36 = arith.constant dense<0xFF800000> : vector<8xf32>
    %81 = vector.multi_reduction <maximumf>, %80, %cst_36 [1] : vector<8x8xf32> to vector<8xf32>
    %82 = vector.shape_cast %81 : vector<8xf32> to vector<8x1xf32>
    %83 = vector.broadcast %82 : vector<8x1xf32> to vector<8x8xf32>
    %84 = arith.subf %80, %83 : vector<8x8xf32>
    %85 = math.exp %84 : vector<8x8xf32>
    %cst_37 = arith.constant dense<0.000000e+00> : vector<8xf32>
    %86 = vector.multi_reduction <add>, %85, %cst_37 [1] : vector<8x8xf32> to vector<8xf32>
    %87 = vector.shape_cast %86 : vector<8xf32> to vector<8x1xf32>
    %88 = tpu.reciprocal %87 {approx = true} : vector<8x1xf32> -> vector<8x1xf32>
    %89 = vector.broadcast %88 : vector<8x1xf32> to vector<8x8xf32>
    %90 = arith.mulf %85, %89 : vector<8x8xf32>
    %cst_38 = arith.constant dense<0.000000e+00> : vector<8x8xf32>
    %91 = tpu.matmul %90, %76, %cst_38 {dimension_numbers = #tpu.dot_dimension_numbers<[1], [0], [0], [1], [0, 0, 1, 1], [], []>} : vector<8x8xf32>, vector<8x8xf32>, vector<8x8xf32> -> vector<8x8xf32>
    %92 = tpu.concatenate %37, %55, %73, %91 in 1 : vector<8x8xf32>, vector<8x8xf32>, vector<8x8xf32>, vector<8x8xf32> -> vector<8x32xf32>
    %c0_39 = arith.constant 0 : index
    %c0_40 = arith.constant 0 : index
    %c0_41 = arith.constant 0 : index
    %c0_42 = arith.constant 0 : index
    %93 = vector.load %arg7[%c0_39, %c0_40, %c0_41, %c0_42] : memref<1x1x32x32xf32, #tpu.memory_space<vmem>>, vector<1x1x32x32xf32>
    %94 = vector.shape_cast %93 : vector<1x1x32x32xf32> to vector<32x32xf32>
    %cst_43 = arith.constant dense<0.000000e+00> : vector<8x32xf32>
    %95 = tpu.matmul %92, %94, %cst_43 {dimension_numbers = #tpu.dot_dimension_numbers<[1], [0], [0], [1], [0, 0, 1, 1], [], []>} : vector<8x32xf32>, vector<32x32xf32>, vector<8x32xf32> -> vector<8x32xf32>
    %c0_44 = arith.constant 0 : index
    %c0_45 = arith.constant 0 : index
    %c0_46 = arith.constant 0 : index
    %c0_47 = arith.constant 0 : index
    %96 = vector.load %arg8[%c0_44, %c0_45, %c0_46, %c0_47] : memref<1x1x1x32xf32, #tpu.memory_space<vmem>>, vector<1x1x1x32xf32>
    %97 = vector.shape_cast %96 : vector<1x1x1x32xf32> to vector<1x32xf32>
    %98 = vector.broadcast %97 : vector<1x32xf32> to vector<8x32xf32>
    %99 = arith.addf %95, %98 : vector<8x32xf32>
    %100 = arith.addf %9, %99 : vector<8x32xf32>
    %cst_48 = arith.constant dense<0.000000e+00> : vector<8xf32>
    %101 = vector.multi_reduction <add>, %100, %cst_48 [1] : vector<8x32xf32> to vector<8xf32>
    %102 = vector.shape_cast %101 : vector<8xf32> to vector<8x1xf32>
    %cst_49 = arith.constant 3.200000e+01 : f32
    %103 = vector.broadcast %cst_49 : f32 to vector<8x1xf32>
    %104 = arith.divf %102, %103 : vector<8x1xf32>
    %105 = vector.broadcast %104 : vector<8x1xf32> to vector<8x32xf32>
    %106 = arith.subf %100, %105 : vector<8x32xf32>
    %107 = arith.mulf %106, %106 : vector<8x32xf32>
    %cst_50 = arith.constant dense<0.000000e+00> : vector<8xf32>
    %108 = vector.multi_reduction <add>, %107, %cst_50 [1] : vector<8x32xf32> to vector<8xf32>
    %109 = vector.shape_cast %108 : vector<8xf32> to vector<8x1xf32>
    %cst_51 = arith.constant 3.200000e+01 : f32
    %110 = vector.broadcast %cst_51 : f32 to vector<8x1xf32>
    %111 = arith.divf %109, %110 : vector<8x1xf32>
    %112 = vector.broadcast %104 : vector<8x1xf32> to vector<8x32xf32>
    %113 = arith.subf %100, %112 : vector<8x32xf32>
    %cst_52 = arith.constant 9.99999974E-6 : f32
    %114 = vector.broadcast %cst_52 : f32 to vector<8x1xf32>
    %115 = arith.addf %111, %114 : vector<8x1xf32>
    %116 = math.rsqrt %115 : vector<8x1xf32>
    %117 = vector.broadcast %116 : vector<8x1xf32> to vector<8x32xf32>
    %118 = arith.mulf %113, %117 : vector<8x32xf32>
    %c0_53 = arith.constant 0 : index
    %c0_54 = arith.constant 0 : index
    %c0_55 = arith.constant 0 : index
    %c0_56 = arith.constant 0 : index
    %119 = vector.load %arg9[%c0_53, %c0_54, %c0_55, %c0_56] : memref<1x1x1x32xf32, #tpu.memory_space<vmem>>, vector<1x1x1x32xf32>
    %120 = vector.shape_cast %119 : vector<1x1x1x32xf32> to vector<1x32xf32>
    %121 = vector.broadcast %120 : vector<1x32xf32> to vector<8x32xf32>
    %122 = arith.mulf %118, %121 : vector<8x32xf32>
    %c0_57 = arith.constant 0 : index
    %c0_58 = arith.constant 0 : index
    %c0_59 = arith.constant 0 : index
    %c0_60 = arith.constant 0 : index
    %123 = vector.load %arg10[%c0_57, %c0_58, %c0_59, %c0_60] : memref<1x1x1x32xf32, #tpu.memory_space<vmem>>, vector<1x1x1x32xf32>
    %124 = vector.shape_cast %123 : vector<1x1x1x32xf32> to vector<1x32xf32>
    %125 = vector.broadcast %124 : vector<1x32xf32> to vector<8x32xf32>
    %126 = arith.addf %122, %125 : vector<8x32xf32>
    %c0_61 = arith.constant 0 : index
    %c0_62 = arith.constant 0 : index
    %c0_63 = arith.constant 0 : index
    %c0_64 = arith.constant 0 : index
    %127 = vector.load %arg11[%c0_61, %c0_62, %c0_63, %c0_64] : memref<1x1x32x2048xf32, #tpu.memory_space<vmem>>, vector<1x1x32x2048xf32>
    %128 = vector.shape_cast %127 : vector<1x1x32x2048xf32> to vector<32x2048xf32>
    %cst_65 = arith.constant dense<0.000000e+00> : vector<8x2048xf32>
    %129 = tpu.matmul %126, %128, %cst_65 {dimension_numbers = #tpu.dot_dimension_numbers<[1], [0], [0], [1], [0, 0, 1, 1], [], []>} : vector<8x32xf32>, vector<32x2048xf32>, vector<8x2048xf32> -> vector<8x2048xf32>
    %c0_66 = arith.constant 0 : index
    %c0_67 = arith.constant 0 : index
    %c0_68 = arith.constant 0 : index
    %c0_69 = arith.constant 0 : index
    %130 = vector.load %arg12[%c0_66, %c0_67, %c0_68, %c0_69] : memref<1x1x1x2048xf32, #tpu.memory_space<vmem>>, vector<1x1x1x2048xf32>
    %131 = vector.shape_cast %130 : vector<1x1x1x2048xf32> to vector<1x2048xf32>
    %132 = vector.broadcast %131 : vector<1x2048xf32> to vector<8x2048xf32>
    %133 = arith.addf %129, %132 : vector<8x2048xf32>
    %cst_70 = arith.constant 0.000000e+00 : f32
    %134 = vector.broadcast %cst_70 : f32 to vector<8x2048xf32>
    %135 = arith.maximumf %133, %134 : vector<8x2048xf32>
    %c0_71 = arith.constant 0 : index
    %c0_72 = arith.constant 0 : index
    %c0_73 = arith.constant 0 : index
    %c0_74 = arith.constant 0 : index
    %136 = vector.load %arg13[%c0_71, %c0_72, %c0_73, %c0_74] : memref<1x1x2048x32xf32, #tpu.memory_space<vmem>>, vector<1x1x2048x32xf32>
    %137 = vector.shape_cast %136 : vector<1x1x2048x32xf32> to vector<2048x32xf32>
    %cst_75 = arith.constant dense<0.000000e+00> : vector<8x32xf32>
    %138 = tpu.matmul %135, %137, %cst_75 {dimension_numbers = #tpu.dot_dimension_numbers<[1], [0], [0], [1], [0, 0, 1, 1], [], []>} : vector<8x2048xf32>, vector<2048x32xf32>, vector<8x32xf32> -> vector<8x32xf32>
    %c0_76 = arith.constant 0 : index
    %c0_77 = arith.constant 0 : index
    %c0_78 = arith.constant 0 : index
    %c0_79 = arith.constant 0 : index
    %139 = vector.load %arg14[%c0_76, %c0_77, %c0_78, %c0_79] : memref<1x1x1x32xf32, #tpu.memory_space<vmem>>, vector<1x1x1x32xf32>
    %140 = vector.shape_cast %139 : vector<1x1x1x32xf32> to vector<1x32xf32>
    %141 = vector.broadcast %140 : vector<1x32xf32> to vector<8x32xf32>
    %142 = arith.addf %138, %141 : vector<8x32xf32>
    %143 = arith.addf %126, %142 : vector<8x32xf32>
    %cst_80 = arith.constant dense<0.000000e+00> : vector<8xf32>
    %144 = vector.multi_reduction <add>, %143, %cst_80 [1] : vector<8x32xf32> to vector<8xf32>
    %145 = vector.shape_cast %144 : vector<8xf32> to vector<8x1xf32>
    %cst_81 = arith.constant 3.200000e+01 : f32
    %146 = vector.broadcast %cst_81 : f32 to vector<8x1xf32>
    %147 = arith.divf %145, %146 : vector<8x1xf32>
    %148 = vector.broadcast %147 : vector<8x1xf32> to vector<8x32xf32>
    %149 = arith.subf %143, %148 : vector<8x32xf32>
    %150 = arith.mulf %149, %149 : vector<8x32xf32>
    %cst_82 = arith.constant dense<0.000000e+00> : vector<8xf32>
    %151 = vector.multi_reduction <add>, %150, %cst_82 [1] : vector<8x32xf32> to vector<8xf32>
    %152 = vector.shape_cast %151 : vector<8xf32> to vector<8x1xf32>
    %cst_83 = arith.constant 3.200000e+01 : f32
    %153 = vector.broadcast %cst_83 : f32 to vector<8x1xf32>
    %154 = arith.divf %152, %153 : vector<8x1xf32>
    %155 = vector.broadcast %147 : vector<8x1xf32> to vector<8x32xf32>
    %156 = arith.subf %143, %155 : vector<8x32xf32>
    %cst_84 = arith.constant 9.99999974E-6 : f32
    %157 = vector.broadcast %cst_84 : f32 to vector<8x1xf32>
    %158 = arith.addf %154, %157 : vector<8x1xf32>
    %159 = math.rsqrt %158 : vector<8x1xf32>
    %160 = vector.broadcast %159 : vector<8x1xf32> to vector<8x32xf32>
    %161 = arith.mulf %156, %160 : vector<8x32xf32>
    %c0_85 = arith.constant 0 : index
    %c0_86 = arith.constant 0 : index
    %c0_87 = arith.constant 0 : index
    %c0_88 = arith.constant 0 : index
    %162 = vector.load %arg15[%c0_85, %c0_86, %c0_87, %c0_88] : memref<1x1x1x32xf32, #tpu.memory_space<vmem>>, vector<1x1x1x32xf32>
    %163 = vector.shape_cast %162 : vector<1x1x1x32xf32> to vector<1x32xf32>
    %164 = vector.broadcast %163 : vector<1x32xf32> to vector<8x32xf32>
    %165 = arith.mulf %161, %164 : vector<8x32xf32>
    %c0_89 = arith.constant 0 : index
    %c0_90 = arith.constant 0 : index
    %c0_91 = arith.constant 0 : index
    %c0_92 = arith.constant 0 : index
    %166 = vector.load %arg16[%c0_89, %c0_90, %c0_91, %c0_92] : memref<1x1x1x32xf32, #tpu.memory_space<vmem>>, vector<1x1x1x32xf32>
    %167 = vector.shape_cast %166 : vector<1x1x1x32xf32> to vector<1x32xf32>
    %168 = vector.broadcast %167 : vector<1x32xf32> to vector<8x32xf32>
    %169 = arith.addf %165, %168 : vector<8x32xf32>
    %c0_93 = arith.constant 0 : index
    %c0_94 = arith.constant 0 : index
    %c0_95 = arith.constant 0 : index
    %170 = vector.load %arg17[%c0_93, %c0_94, %c0_95] : memref<1x8x32xf32, #tpu.memory_space<vmem>>, vector<1x8x32xf32>
    %171 = vector.shape_cast %170 : vector<1x8x32xf32> to vector<8x32xf32>
    %172 = vector.shape_cast %169 : vector<8x32xf32> to vector<1x8x32xf32>
    tpu.vector_store %arg17[%c0_93, %c0_94, %c0_95], %172 {strides = array<i32>} : memref<1x8x32xf32, #tpu.memory_space<vmem>>, vector<1x8x32xf32>,
    return
  }
  func.func @transform_0(%arg0: i32) -> (i32, i32, i32) {
    %c0_i32 = arith.constant 0 : i32
    %c0_i32_0 = arith.constant 0 : i32
    %c0_i32_1 = arith.constant 0 : i32
    return %arg0, %c0_i32, %c0_i32_0 : i32, i32, i32
  }
  func.func @transform_1(%arg0: i32) -> (i32, i32) {
    %c0_i32 = arith.constant 0 : i32
    %c0_i32_0 = arith.constant 0 : i32
    %c0_i32_1 = arith.constant 0 : i32
    return %c0_i32, %c0_i32_0 : i32, i32
  }
  func.func @transform_2(%arg0: i32) -> (i32, i32, i32) {
    %c0_i32 = arith.constant 0 : i32
    %c0_i32_0 = arith.constant 0 : i32
    %c0_i32_1 = arith.constant 0 : i32
    return %arg0, %c0_i32, %c0_i32_0 : i32, i32, i32
  }
  func.func @transform_3(%arg0: i32) -> (i32, i32, i32) {
    %c0_i32 = arith.constant 0 : i32
    %c0_i32_0 = arith.constant 0 : i32
    %c0_i32_1 = arith.constant 0 : i32
    return %arg0, %c0_i32, %c0_i32_0 : i32, i32, i32
  }
  func.func @transform_4(%arg0: i32) -> (i32, i32, i32, i32) {
    %c0_i32 = arith.constant 0 : i32
    %c0_i32_0 = arith.constant 0 : i32
    %c0_i32_1 = arith.constant 0 : i32
    %c0_i32_2 = arith.constant 0 : i32
    return %arg0, %c0_i32, %c0_i32_0, %c0_i32_1 : i32, i32, i32, i32
  }
  func.func @transform_5(%arg0: i32) -> (i32, i32, i32, i32) {
    %c0_i32 = arith.constant 0 : i32
    %c0_i32_0 = arith.constant 0 : i32
    %c0_i32_1 = arith.constant 0 : i32
    %c0_i32_2 = arith.constant 0 : i32
    return %arg0, %c0_i32, %c0_i32_0, %c0_i32_1 : i32, i32, i32, i32
  }
  func.func @transform_6(%arg0: i32) -> (i32, i32, i32, i32) {
    %c0_i32 = arith.constant 0 : i32
    %c0_i32_0 = arith.constant 0 : i32
    %c0_i32_1 = arith.constant 0 : i32
    %c0_i32_2 = arith.constant 0 : i32
    return %arg0, %c0_i32, %c0_i32_0, %c0_i32_1 : i32, i32, i32, i32
  }
  func.func @transform_7(%arg0: i32) -> (i32, i32, i32, i32) {
    %c0_i32 = arith.constant 0 : i32
    %c0_i32_0 = arith.constant 0 : i32
    %c0_i32_1 = arith.constant 0 : i32
    %c0_i32_2 = arith.constant 0 : i32
    return %arg0, %c0_i32, %c0_i32_0, %c0_i32_1 : i32, i32, i32, i32
  }
  func.func @transform_8(%arg0: i32) -> (i32, i32, i32, i32) {
    %c0_i32 = arith.constant 0 : i32
    %c0_i32_0 = arith.constant 0 : i32
    %c0_i32_1 = arith.constant 0 : i32
    %c0_i32_2 = arith.constant 0 : i32
    return %arg0, %c0_i32, %c0_i32_0, %c0_i32_1 : i32, i32, i32, i32
  }
  func.func @transform_9(%arg0: i32) -> (i32, i32, i32, i32) {
    %c0_i32 = arith.constant 0 : i32
    %c0_i32_0 = arith.constant 0 : i32
    %c0_i32_1 = arith.constant 0 : i32
    %c0_i32_2 = arith.constant 0 : i32
    return %arg0, %c0_i32, %c0_i32_0, %c0_i32_1 : i32, i32, i32, i32
  }
  func.func @transform_10(%arg0: i32) -> (i32, i32, i32, i32) {
    %c0_i32 = arith.constant 0 : i32
    %c0_i32_0 = arith.constant 0 : i32
    %c0_i32_1 = arith.constant 0 : i32
    %c0_i32_2 = arith.constant 0 : i32
    return %arg0, %c0_i32, %c0_i32_0, %c0_i32_1 : i32, i32, i32, i32
  }
  func.func @transform_11(%arg0: i32) -> (i32, i32, i32, i32) {
    %c0_i32 = arith.constant 0 : i32
    %c0_i32_0 = arith.constant 0 : i32
    %c0_i32_1 = arith.constant 0 : i32
    %c0_i32_2 = arith.constant 0 : i32
    return %arg0, %c0_i32, %c0_i32_0, %c0_i32_1 : i32, i32, i32, i32
  }
  func.func @transform_12(%arg0: i32) -> (i32, i32, i32, i32) {
    %c0_i32 = arith.constant 0 : i32
    %c0_i32_0 = arith.constant 0 : i32
    %c0_i32_1 = arith.constant 0 : i32
    %c0_i32_2 = arith.constant 0 : i32
    return %arg0, %c0_i32, %c0_i32_0, %c0_i32_1 : i32, i32, i32, i32
  }
  func.func @transform_13(%arg0: i32) -> (i32, i32, i32, i32) {
    %c0_i32 = arith.constant 0 : i32
    %c0_i32_0 = arith.constant 0 : i32
    %c0_i32_1 = arith.constant 0 : i32
    %c0_i32_2 = arith.constant 0 : i32
    return %arg0, %c0_i32, %c0_i32_0, %c0_i32_1 : i32, i32, i32, i32
  }
  func.func @transform_14(%arg0: i32) -> (i32, i32, i32, i32) {
    %c0_i32 = arith.constant 0 : i32
    %c0_i32_0 = arith.constant 0 : i32
    %c0_i32_1 = arith.constant 0 : i32
    %c0_i32_2 = arith.constant 0 : i32
    return %arg0, %c0_i32, %c0_i32_0, %c0_i32_1 : i32, i32, i32, i32
  }
  func.func @transform_15(%arg0: i32) -> (i32, i32, i32, i32) {
    %c0_i32 = arith.constant 0 : i32
    %c0_i32_0 = arith.constant 0 : i32
    %c0_i32_1 = arith.constant 0 : i32
    %c0_i32_2 = arith.constant 0 : i32
    return %arg0, %c0_i32, %c0_i32_0, %c0_i32_1 : i32, i32, i32, i32
  }
  func.func @transform_16(%arg0: i32) -> (i32, i32, i32) {
    %c0_i32 = arith.constant 0 : i32
    %c0_i32_0 = arith.constant 0 : i32
    %c0_i32_1 = arith.constant 0 : i32
    return %arg0, %c0_i32, %c0_i32_0 : i32, i32, i32
  }
}

module attributes {stable_mosaic.version = 11 : i64} {
  func.func @_mlp_kernel(%arg0: memref<2x384xf32, #tpu.memory_space<vmem>>, %arg1: memref<384x64xf32, #tpu.memory_space<vmem>>, %arg2: memref<1x64xf32, #tpu.memory_space<vmem>>, %arg3: memref<64x32xf32, #tpu.memory_space<vmem>>, %arg4: memref<1x32xf32, #tpu.memory_space<vmem>>, %arg5: memref<32x1xf32, #tpu.memory_space<vmem>>, %arg6: memref<1x1xf32, #tpu.memory_space<vmem>>, %arg7: memref<2x1xf32, #tpu.memory_space<vmem>>) attributes {dimension_semantics = [], scalar_prefetch = 0 : i64, scratch_operands = 0 : i64, tpu.core_type = #tpu.core_type<tc>} {
    %c0 = arith.constant 0 : index
    %c0_0 = arith.constant 0 : index
    %0 = vector.load %arg0[%c0, %c0_0] : memref<2x384xf32, #tpu.memory_space<vmem>>, vector<2x384xf32>
    %c0_1 = arith.constant 0 : index
    %c0_2 = arith.constant 0 : index
    %1 = vector.load %arg1[%c0_1, %c0_2] : memref<384x64xf32, #tpu.memory_space<vmem>>, vector<384x64xf32>
    %cst = arith.constant dense<0.000000e+00> : vector<2x64xf32>
    %2 = tpu.matmul %0, %1, %cst {dimension_numbers = #tpu.dot_dimension_numbers<[1], [0], [0], [1], [0, 0, 1, 1], [], []>} : vector<2x384xf32>, vector<384x64xf32>, vector<2x64xf32> -> vector<2x64xf32>
    %c0_3 = arith.constant 0 : index
    %c0_4 = arith.constant 0 : index
    %3 = vector.load %arg2[%c0_3, %c0_4] : memref<1x64xf32, #tpu.memory_space<vmem>>, vector<1x64xf32>
    %4 = vector.broadcast %3 : vector<1x64xf32> to vector<2x64xf32>
    %5 = arith.addf %2, %4 : vector<2x64xf32>
    %c0_5 = arith.constant 0 : index
    %c0_6 = arith.constant 0 : index
    %6 = vector.load %arg3[%c0_5, %c0_6] : memref<64x32xf32, #tpu.memory_space<vmem>>, vector<64x32xf32>
    %cst_7 = arith.constant dense<0.000000e+00> : vector<2x32xf32>
    %7 = tpu.matmul %5, %6, %cst_7 {dimension_numbers = #tpu.dot_dimension_numbers<[1], [0], [0], [1], [0, 0, 1, 1], [], []>} : vector<2x64xf32>, vector<64x32xf32>, vector<2x32xf32> -> vector<2x32xf32>
    %c0_8 = arith.constant 0 : index
    %c0_9 = arith.constant 0 : index
    %8 = vector.load %arg4[%c0_8, %c0_9] : memref<1x32xf32, #tpu.memory_space<vmem>>, vector<1x32xf32>
    %9 = vector.broadcast %8 : vector<1x32xf32> to vector<2x32xf32>
    %10 = arith.addf %7, %9 : vector<2x32xf32>
    %cst_10 = arith.constant 0.000000e+00 : f32
    %11 = vector.broadcast %cst_10 : f32 to vector<2x32xf32>
    %12 = arith.maximumf %10, %11 : vector<2x32xf32>
    %c0_11 = arith.constant 0 : index
    %c0_12 = arith.constant 0 : index
    %13 = vector.load %arg5[%c0_11, %c0_12] : memref<32x1xf32, #tpu.memory_space<vmem>>, vector<32x1xf32>
    %cst_13 = arith.constant dense<0.000000e+00> : vector<2x1xf32>
    %14 = tpu.matmul %12, %13, %cst_13 {dimension_numbers = #tpu.dot_dimension_numbers<[1], [0], [0], [1], [0, 0, 1, 1], [], []>} : vector<2x32xf32>, vector<32x1xf32>, vector<2x1xf32> -> vector<2x1xf32>
    %c0_14 = arith.constant 0 : index
    %c0_15 = arith.constant 0 : index
    %15 = vector.load %arg6[%c0_14, %c0_15] : memref<1x1xf32, #tpu.memory_space<vmem>>, vector<1x1xf32>
    %16 = vector.broadcast %15 : vector<1x1xf32> to vector<2x1xf32>
    %17 = arith.addf %14, %16 : vector<2x1xf32>
    %c0_16 = arith.constant 0 : index
    %c0_17 = arith.constant 0 : index
    %18 = vector.load %arg7[%c0_16, %c0_17] : memref<2x1xf32, #tpu.memory_space<vmem>>, vector<2x1xf32>
    tpu.vector_store %arg7[%c0_16, %c0_17], %17 {strides = array<i32>} : memref<2x1xf32, #tpu.memory_space<vmem>>, vector<2x1xf32>,
    return
  }
}

</mosaic_0001>

<bundles_post_ra>
// kernel: tmodel_forward.3
= control target key start
LH: loop header
LB: loop body
LE: loop exit
PB: predicated region body
PF: predicated region fallthrough
CT: control target
= control target key end

     0   :  { %v640_v3 = vmov 0.0|0.0   ;;  %vm641_vm0 = vmmov 0   ;;  %v642_v8 = vmov 0.0   ;;  %v643_v20 = vmov 1983009808   ;;  %s903_s1 = inlined_call_operand.vmem [shape: f32[384,64], index: 1, kind: input, shape index: {}]   ;;  %s904_s0 = inlined_call_operand.vmem [shape: f32[2,384], index: 0, kind: input, shape index: {}]   ;;  %s905_s3 = inlined_call_operand.vmem [shape: f32[64,32], index: 3, kind: input, shape index: {}]   ;;  %s906_s5 = inlined_call_operand.vmem [shape: f32[32,1], index: 5, kind: input, shape index: {}]   ;;  %s907_s2 = inlined_call_operand.vmem [shape: f32[1,64], index: 2, kind: input, shape index: {}]   ;;  %s908_s6 = inlined_call_operand.<no memory space> [shape: f32[1,1], index: 6, kind: input, shape index: {}]   ;;  %s909_s4 = inlined_call_operand.vmem [shape: f32[1,32], index: 4, kind: input, shape index: {}]   ;;  %s910_s7 = inlined_call_operand.vmem [shape: f32[2,1], index: 7, kind: output, shape index: {}]  }
   0x1   :  { %v45_v0 = vld [vmem:[%s903_s1 + $0x80] sm:$0xff]  ;;  %v46_v1 = vld [vmem:[%s903_s1 + $0x88] sm:$0xff]  ;;  %593 = vmatprep.subr.bf16.mxu1 %v640_v3  ;;  %v47_v6 = vld [vmem:[%s903_s1 + $0x90] sm:$0xff]  ;;  %528 = vmatprep.mubr.msk.f32.mxu1 %vm641_vm0, %v642_v8  ;;  %v87_v21 = vunpack.c.l.s4 %v643_v20  ;;  %v89_v22 = vlaneseq  ;;  %vm259_vm1 = vcmask 523264   ;;  %vm345_vm2 = vcmask 261120  }
   0x2   :  { %v29_v2 = vld [vmem:[%s903_s1] sm:$0xff]  ;;  %v561_v4 = vpack.c.bf16 %v46_v1, %v45_v0  ;;  %v30_v5 = vld [vmem:[%s903_s1 + $0x8] sm:$0xff]  ;;  %v48_v7 = vld [vmem:[%s903_s1 + $0x98] sm:$0xff]  ;;  %vm419_vm3 = vcmask 1024  }
   0x3   :  { %v563_v9 = vpack.c.bf16 %v30_v5, %v29_v2  ;;  %v565_v10 = vpack.c.bf16 %v48_v7, %v47_v6  ;;  %v31_v11 = vld [vmem:[%s903_s1 + $0x10] sm:$0xff]  ;;  %v32_v12 = vld [vmem:[%s903_s1 + $0x18] sm:$0xff]  ;;  %v61_v13 = vld [vmem:[%s903_s1 + $0x100] sm:$0xff]  ;;  %v88_v33 = vunpack.c.0.s8 %v87_v21  ;;  %v90_v34 = vshrl.u32 %v89_v22, 7 }
   0x4   :  { %562 = vmatprep.subr.bf16.mxu0 %v561_v4  ;;  %v62_v14 = vld [vmem:[%s903_s1 + $0x108] sm:$0xff]  ;;  %v49_v15 = vld [vmem:[%s903_s1 + $0xa0] sm:$0xff]  ;;  %v567_v17 = vpack.c.bf16 %v32_v12, %v31_v11  ;;  %v63_v19 = vld [vmem:[%s903_s1 + $0x110] sm:$0xff] }
   0x5   :  { %v50_v16 = vld [vmem:[%s903_s1 + $0xa8] sm:$0xff]  ;;  %564 = vmatpush3.bf16.msra.mxu0 %v563_v9  ;;  %v594_v18 = vpack.c.bf16 %v62_v14, %v61_v13  ;;  %v33_v24 = vld [vmem:[%s903_s1 + $0x20] sm:$0xff]  ;;  %v64_v26 = vld [vmem:[%s903_s1 + $0x118] sm:$0xff]  ;;  %v767_v44 = vsub.s32 %v88_v33, %v90_v34 }
   0x6   :  { %566 = vmatprep.subr.bf16.mxu0 %v565_v10  ;;  %v569_v23 = vpack.c.bf16 %v50_v16, %v49_v15  ;;  %v34_v25 = vld [vmem:[%s903_s1 + $0x28] sm:$0xff]  ;;  %v597_v27 = vpack.c.bf16 %v64_v26, %v63_v19  ;;  %v51_v28 = vld [vmem:[%s903_s1 + $0xb0] sm:$0xff]  ;;  %v52_v29 = vld [vmem:[%s903_s1 + $0xb8] sm:$0xff] }
   0x7   :  { %595 = vmatpush3.bf16.msra.mxu1 %v594_v18  ;;  %v65_v30 = vld [vmem:[%s903_s1 + $0x120] sm:$0xff]  ;;  %v66_v31 = vld [vmem:[%s903_s1 + $0x128] sm:$0xff]  ;;  %v571_v32 = vpack.c.bf16 %v34_v25, %v33_v24  ;;  %v573_v35 = vpack.c.bf16 %v52_v29, %v51_v28  ;;  %v35_v36 = vld [vmem:[%s903_s1 + $0x30] sm:$0xff] }
   0x8   :  { %596 = vmatprep.subr.bf16.mxu1 %v640_v3  ;;  %v36_v37 = vld [vmem:[%s903_s1 + $0x38] sm:$0xff]  ;;  %v600_v38 = vpack.c.bf16 %v66_v31, %v65_v30  ;;  %v53_v39 = vld [vmem:[%s903_s1 + $0xc0] sm:$0xff]  ;;  %v54_v40 = vld [vmem:[%s903_s1 + $0xc8] sm:$0xff] }
   0x9   :  { %568 = vmatpush3.bf16.msra.mxu0 %v567_v17  ;;  %v67_v41 = vld [vmem:[%s903_s1 + $0x130] sm:$0xff]  ;;  %v68_v42 = vld [vmem:[%s903_s1 + $0x138] sm:$0xff]  ;;  %v575_v43 = vpack.c.bf16 %v36_v37, %v35_v36  ;;  %v577_v45 = vpack.c.bf16 %v54_v40, %v53_v39  ;;  %v37_v46 = vld [vmem:[%s903_s1 + $0x40] sm:$0xff] }
   0xa   :  { %570 = vmatprep.subr.bf16.mxu0 %v569_v23  ;;  %v38_v47 = vld [vmem:[%s903_s1 + $0x48] sm:$0xff]  ;;  %v603_v48 = vpack.c.bf16 %v68_v42, %v67_v41  ;;  %v55_v49 = vld [vmem:[%s903_s1 + $0xd0] sm:$0xff]  ;;  %v56_v50 = vld [vmem:[%s903_s1 + $0xd8] sm:$0xff] }
   0xb   :  { %598 = vmatpush3.bf16.msra.mxu1 %v597_v27  ;;  %v69_v51 = vld [vmem:[%s903_s1 + $0x140] sm:$0xff]  ;;  %v70_v52 = vld [vmem:[%s903_s1 + $0x148] sm:$0xff]  ;;  %v579_v54 = vpack.c.bf16 %v38_v47, %v37_v46  ;;  %v581_v56 = vpack.c.bf16 %v56_v50, %v55_v49  ;;  %v39_v57 = vld [vmem:[%s903_s1 + $0x50] sm:$0xff]  ;;  %v12_v47 = vstv %s908_s6 }
   0xc   :  { %599 = vmatprep.subr.bf16.mxu1 %v640_v3  ;;  %v28_v53 = vld [vmem:[%s904_s0] sm:$0x3f]  ;;  %v40_v58 = vld [vmem:[%s903_s1 + $0x58] sm:$0xff]  ;;  %v606_v59 = vpack.c.bf16 %v70_v52, %v69_v51  ;;  %v58_v61 = vld [vmem:[%s903_s1 + $0xe8] sm:$0xff]  ;;  %13 = vst [vmem:[#allocation2] sm:$0x1] %v12_v47 }
   0xd   :  { %572 = vmatpush3.bf16.msra.mxu0 %v571_v32  ;;  %v92_v55 = vrot.slane %v28_v53, %v767_v44  ;;  %v57_v60 = vld [vmem:[%s903_s1 + $0xe0] sm:$0xff]  ;;  %v71_v63 = vld [vmem:[%s903_s1 + $0x150] sm:$0xff]  ;;  %v72_v0 = vld [vmem:[%s903_s1 + $0x158] sm:$0xff]  ;;  %v583_v1 = vpack.c.bf16 %v40_v58, %v39_v57  ;;  %v85_v20 = vcombine.high %v28_v53, %v28_v53 }
   0xe   :  { %574 = vmatprep.subr.bf16.mxu0 %v573_v35  ;;  %v585_v2 = vpack.c.bf16 %v58_v61, %v57_v60  ;;  %v41_v4 = vld [vmem:[%s903_s1 + $0x60] sm:$0xff]  ;;  %v42_v5 = vld [vmem:[%s903_s1 + $0x68] sm:$0xff]  ;;  %v609_v6 = vpack.c.bf16 %v72_v0, %v71_v63  ;;  %v59_v7 = vld [vmem:[%s903_s1 + $0xf0] sm:$0xff] }
   0xf   :  { %601 = vmatpush3.bf16.msra.mxu1 %v600_v38  ;;  %v100_v62 = vcombine.high %v92_v55, %v92_v55  ;;  %v60_v9 = vld [vmem:[%s903_s1 + $0xf8] sm:$0xff]  ;;  %v73_v10 = vld [vmem:[%s903_s1 + $0x160] sm:$0xff]  ;;  %v74_v11 = vld [vmem:[%s903_s1 + $0x168] sm:$0xff]  ;;  %v587_v12 = vpack.c.bf16 %v42_v5, %v41_v4  ;;  %v99_v25 = vrot.slane %v85_v20, %v767_v44 }
  0x10   :  { %602 = vmatprep.subr.bf16.mxu1 %v640_v3  ;;  %v589_v13 = vpack.c.bf16 %v60_v9, %v59_v7  ;;  %v43_v14 = vld [vmem:[%s903_s1 + $0x70] sm:$0xff]  ;;  %v44_v15 = vld [vmem:[%s903_s1 + $0x78] sm:$0xff]  ;;  %v612_v16 = vpack.c.bf16 %v74_v11, %v73_v10  ;;  %v244_v21 = vld [vmem:[%s905_s3] sm:$0xff] }
  0x11   :  { %576 = vmatpush3.bf16.msra.mxu0 %v575_v43  ;;  %168 = vmatprep.mubr.f32.mxu0 %v100_v62  ;;  %v75_v17 = vld [vmem:[%s903_s1 + $0x170] sm:$0xff]  ;;  %v76_v18 = vld [vmem:[%s903_s1 + $0x178] sm:$0xff]  ;;  %v591_v19 = vpack.c.bf16 %v44_v15, %v43_v14  ;;  %v245_v22 = vld [vmem:[%s905_s3 + $0x8] sm:$0xff] }
  0x12   :  { %578 = vmatprep.subr.bf16.mxu0 %v577_v45  ;;  %v615_v23 = vpack.c.bf16 %v76_v18, %v75_v17  ;;  %v618_v24 = vpack.c.bf16 %v245_v22, %v244_v21  ;;  %v246_v26 = vld [vmem:[%s905_s3 + $0x10] sm:$0xff]  ;;  %v247_v27 = vld [vmem:[%s905_s3 + $0x18] sm:$0xff]  ;;  %v248_v29 = vld [vmem:[%s905_s3 + $0x20] sm:$0xff] }
  0x13   :  { %604 = vmatpush3.bf16.msra.mxu1 %v603_v48  ;;  %v621_v28 = vpack.c.bf16 %v247_v27, %v246_v26  ;;  %v249_v30 = vld [vmem:[%s905_s3 + $0x28] sm:$0xff]  ;;  %v250_v32 = vld [vmem:[%s905_s3 + $0x30] sm:$0xff]  ;;  %v334_v34 = vld [vmem:[%s906_s5] sm:$0xff] }
  0x14   :  { %605 = vmatprep.subr.bf16.mxu1 %v640_v3  ;;  %v624_v31 = vpack.c.bf16 %v249_v30, %v248_v29  ;;  %v335_v35 = vld [vmem:[%s906_s5 + $0x8] sm:$0xff]  ;;  %v425_v39 = vld [vmem:[%s907_s2] ss:$0 sm:$0xff]  ;;  %v336_v45 = vld [vmem:[%s906_s5 + $0x10] sm:$0xff] }
  0x15   :  { %580 = vmatpush3.bf16.msra.mxu0 %v579_v54  ;;  %v630_v36 = vpack.c.bf16 %v335_v35, %v334_v34  ;;  %v426_v48 = vld [vmem:[%s909_s4] ss:$0 sm:$0xff] }
  0x16   :  { %582 = vmatprep.subr.bf16.mxu0 %v581_v56  ;;  %v428_v53 = vld [vmem:[#allocation2] ss:$0 sm:$0xff] }
  0x17   :  { %607 = vmatpush3.bf16.msra.mxu1 %v606_v59 }
  0x18   :  { %608 = vmatprep.subr.bf16.mxu1 %v640_v3 }
  0x19   :  { %584 = vmatpush3.bf16.msra.mxu0 %v583_v1 }
  0x1a   :  { %586 = vmatprep.subr.bf16.mxu0 %v585_v2 }
  0x1b   :  { %610 = vmatpush3.bf16.msra.mxu1 %v609_v6 }
  0x1c   :  { %611 = vmatprep.subr.bf16.mxu1 %v640_v3 }
  0x1d   :  { %588 = vmatpush3.bf16.msra.mxu0 %v587_v12 }
  0x1e   :  { %590 = vmatprep.subr.bf16.mxu0 %v589_v13 }
  0x1f   :  { %613 = vmatpush3.bf16.msra.mxu1 %v612_v16 }
  0x20   :  { %614 = vmatprep.subr.bf16.mxu1 %v640_v3 }
  0x21   :  { %592 = vmatpush3.bf16.msra.mxu0 %v591_v19 }
  0x22   :  { %617 = vmatprep.subr.bf16.mxu0 %v640_v3 }
  0x23   :  { %616 = vmatpush3.bf16.msra.mxu1 %v615_v23 }
  0x24   :  { %169 = vmatmul.mubr.f32.vlgmr.msra.gmra.mrb[0].mxu0 %v92_v55  ;;  %629 = vmatprep.subr.bf16.mxu1 %v640_v3 }
  0x25   :  { %619 = vmatpush3.bf16.msra.mxu0 %v618_v24  ;;  %547 = vmatprep.mubr.msk.f32.mxu0 %vm641_vm0, %v642_v8 }
  0x26   :  { %529 = vmatmul.mubr.f32.vlgmr.msra.gmra.mrb[0].mxu1 %v99_v25  ;;  %620 = vmatprep.subr.bf16.mxu0 %v640_v3 }
  0x27   :  { %558 = vmatprep.mubr.msk.f32.mxu1 %vm641_vm0, %v642_v8  ;;  %v251_v8 = vld [vmem:[%s905_s3 + $0x38] sm:$0xff]  ;;  %631 = vmatpush3.bf16.msra.mxu1 %v630_v36 }
  0x28   :  { %v627_v33 = vpack.c.bf16 %v251_v8, %v250_v32  ;;  %632 = vmatprep.subr.bf16.mxu1 %v640_v3 }
  0x29   :  { %622 = vmatpush3.bf16.msra.mxu0 %v621_v28 }
  0x2a   :  { %623 = vmatprep.subr.bf16.mxu0 %v640_v3 }
  0x2d   :  { %625 = vmatpush3.bf16.msra.mxu0 %v624_v31 }
  0x2e   :  { %626 = vmatprep.subr.bf16.mxu0 %v640_v3  ;;  %v337_v3 = vld [vmem:[%s906_s5 + $0x18] sm:$0xff] }
  0x2f   :  { %v633_v46 = vpack.c.bf16 %v337_v3, %v336_v45 }
  0x31   :  { %628 = vmatpush3.bf16.msra.mxu0 %v627_v33  ;;  %634 = vmatpush3.bf16.msra.mxu1 %v633_v46 }
  0xf7   :  { %v462_v37 = vpop.f32.mrb[0].mxu0 }
  0xf8   :  { %v463_v38 = vpop.f32.mrb[1].mxu0 }
  0xf9   :  { %v464_v40 = vadd.f32 %v463_v38, %v462_v37  ;;  %v240_v41 = vpop.f32.mrb[0].mxu1 }
  0xfa   :  { %v530_v42 = vpop.f32.mrb[1].mxu1 }
  0xfb   :  { %v171_v43 = vadd.f32 %v464_v40, %v425_v39 }
  0xfd   :  { %v241_v44 = vadd.f32 %v240_v41, %v171_v43 }
  0xff   :  { %548 = vmatmul.mubr.msk.f32.vlgmr.msra.gmra.mrb[2].mxu0 %vm259_vm1, %v241_v44 }
 0x1d2   :  { %v329_v49 = vpop.f32.mrb[2].mxu0 }
 0x1d3   :  { %v330_v50 = vadd.f32 %v426_v48, %v329_v49  ;;  %v549_v51 = vpop.f32.mrb[3].mxu0 }
 0x1d5   :  { %v333_v52 = vmax.f32 %v330_v50, 0.0 }
 0x1d7   :  { %559 = vmatmul.mubr.msk.f32.vlgmr.msra.gmra.mrb[2].mxu1 %vm345_vm2, %v333_v52 }
 0x2aa   :  { %v415_v54 = vpop.f32.mrb[2].mxu1 }
 0x2ab   :  { %v416_v55 = vadd.f32 %v428_v53, %v415_v54  ;;  %v560_v56 = vpop.f32.mrb[3].mxu1 }
 0x2ad   :  { %420 = vst.msk [vmem:[%s910_s7] sm:$0x3] %vm419_vm3, %v416_v55 }

// kernel: tmodel_forward.2
= control target key start
LH: loop header
LB: loop body
LE: loop exit
PB: predicated region body
PF: predicated region fallthrough
CT: control target
= control target key end

     0   :  { %s4419_s21 = smov 0   ;;  %s5031_s0 = inlined_call_operand.vmem [shape: f32[3,8,4], index: 0, kind: input, shape index: {}]   ;;  %s5032_s1 = inlined_call_operand.vmem [shape: f32[8,8], index: 1, kind: input, shape index: {}]   ;;  %s5033_s2 = inlined_call_operand.vmem [shape: f32[3,4,32], index: 2, kind: input, shape index: {}]   ;;  %s5034_s3 = inlined_call_operand.vmem [shape: f32[3,1,32], index: 3, kind: input, shape index: {}]   ;;  %s5035_s4 = inlined_call_operand.vmem [shape: f32[3,1,32,96], index: 4, kind: input, shape index: {}]   ;;  %s5036_s5 = inlined_call_operand.vmem [shape: f32[3,1,1,96], index: 5, kind: input, shape index: {}]   ;;  %s5037_s6 = inlined_call_operand.vmem [shape: f32[3,1,32,32], index: 6, kind: input, shape index: {}]   ;;  %s5038_s7 = inlined_call_operand.vmem [shape: f32[3,1,1,32], index: 7, kind: input, shape index: {}]   ;;  %s5039_s8 = inlined_call_operand.vmem [shape: f32[3,1,1,32], index: 8, kind: input, shape index: {}]   ;;  %s5040_s9 = inlined_call_operand.vmem [shape: f32[3,1,1,32], index: 9, kind: input, shape index: {}]   ;;  %s5041_s10 = inlined_call_operand.vmem [shape: f32[3,1,32,2048], index: 10, kind: input, shape index: {}]   ;;  %s5042_s11 = inlined_call_operand.vmem [shape: f32[3,1,1,2048], index: 11, kind: input, shape index: {}]   ;;  %s5043_s12 = inlined_call_operand.vmem [shape: f32[3,1,2048,32], index: 12, kind: input, shape index: {}]   ;;  %s5044_s13 = inlined_call_operand.vmem [shape: f32[3,1,1,32], index: 13, kind: input, shape index: {}]   ;;  %s5045_s14 = inlined_call_operand.vmem [shape: f32[3,1,1,32], index: 14, kind: input, shape index: {}]   ;;  %s5046_s15 = inlined_call_operand.vmem [shape: f32[3,1,1,32], index: 15, kind: input, shape index: {}]   ;;  %s5047_s16 = inlined_call_operand.vmem [shape: f32[3,8,32], index: 16, kind: output, shape index: {}]  }
   0x1   :  { %5048 = sst [smem:[#allocation2_spill]] %s5031_s0 }
   0x2 LB: > { %s3502_s22 = sadd.s32 4294967295, %s4315_s21   ;;  %p3506_p0 = scmp.ge.s32.totalorder %s4315_s21, 1  ;;  %s4315_s21 = sphi %s4419_s21, %s26_s21  }
   0x3   : > { %p583_p1 = scmp.lt.s32.totalorder %s4315_s21, 4 }
   0x5   : > { %p584_p2 = pnand %p3506_p0, %p583_p1 }
   0x6   : > { %p683_p3 = scmp.lt.s32.totalorder (!%p584_p2), %s3502_s22, 2  ;;  %v4317_v0 = vmov (!%p584_p2), 0.0   ;;  %vm4318_vm0 = vmmov (!%p584_p2), 0   ;;  %v4319_v1 = vmov (!%p584_p2), 0.0|0.0   ;;  %vm757_vm1 = vcmask (!%p584_p2), 1043456   ;;  %s5049_s30 = sld [smem:[#allocation2_spill]] (!%p584_p2) }
   0x7   : > { %587 = sbr.rel (%p584_p2) target bundleno = 3383 (0xd37), region = 84  ;;  %3865 = vmatprep.subr.mxu0 (!%p584_p2), %v4317_v0  ;;  %3867 = vmatprep.mubr.msk.f32.mxu0 (!%p584_p2), %vm4318_vm0, %v4317_v0  ;;  %vm753_vm2 = vcmask (!%p584_p2), 31744   ;;  %vm842_vm3 = vcmask (!%p584_p2), 261120   ;;  %s4322_s18 = smov (!%p584_p2), 88   ;;  %vm919_vm4 = vcmask (!%p584_p2), 64512   ;;  %v743_v24 = vld [vmem:[%s5032_s1] sm:$0xff] (!%p584_p2) }
   0x8   : > { %3932 = vmatprep.subr.bf16.mxu1 (!%p584_p2), %v4319_v1  ;;  %3878 = vmatprep.mubr.msk.f32.mxu1 (!%p584_p2), %vm4318_vm0, %v4317_v0  ;;  %s4323_s19 = smov (!%p584_p2), 120   ;;  %s4327_s28 = smov (!%p584_p2), 104   ;;  %vm1597_vm5 = vcmask (!%p584_p2), 130048   ;;  %vm1599_vm6 = vcmask (!%p584_p2), 195584  }
   0x9   : > { %s4332_s24 = smov (!%p584_p2), 16  }
   0xe   : > { %s5051_s22 = smov (!%p683_p3, %s3502_s22), 2 }
   0xf   : > { %s3508_s23 = sshll.u32 %s5051_s22, 2  ;;  %s3507_s27 = sshll.u32 %s5051_s22, 3 }
  0x10   : > { %s690_s26 = scalar_lea.vmem %s5033_s2, %s3508_s23  ;;  %s686_s0 = scalar_lea.vmem %s5049_s30, %s3507_s27 }
  0x11   : > { %v745_v2 = vld [vmem:[%s690_s26] sm:$0xf]  ;;  %s3553_s17 = sshll.u32 %s5051_s22, 5  ;;  %s693_s25 = scalar_lea.vmem %s5034_s3, %s5051_s22 }
  0x12   : > { %3866 = vmatpush3.msk.msra.mxu0 %vm757_vm1, %v745_v2  ;;  %v744_v3 = vld [vmem:[%s686_s0] sm:$0xff]  ;;  %s698_s20 = scalar_lea.vmem %s5035_s4, %s3553_s17  ;;  %s701_s29 = scalar_lea.vmem %s5036_s5, %s5051_s22 }
  0x13   : > { %3881 = vmatprep.subr.mxu0 %v4317_v0  ;;  %3868 = vmatmul.mubr.msk.f32.vlgmr.msra.gmra.mrb[0].mxu0 %vm753_vm2, %v744_v3  ;;  %v831_v4 = vld [vmem:[%s698_s20] sm:$0xff]  ;;  %v832_v5 = vld [vmem:[%s698_s20 + $0x8] sm:$0xff]  ;;  %v833_v7 = vld [vmem:[%s698_s20 + $0x10] sm:$0xff]  ;;  %s4320_s30 = smov 64   ;;  %s4321_s0 = smov 96  }
  0x14   : > { %3883 = vmatprep.mubr.msk.f32.mxu0 %vm4318_vm0, %v4317_v0  ;;  %v3933_v6 = vpack.c.bf16 %v832_v5, %v831_v4  ;;  %v834_v8 = vld [vmem:[%s698_s20 + $0x18] sm:$0xff]  ;;  %v3519_v10 = vld [vmem:[%s693_s25] ss:$0 sm:$0xff]  ;;  %s4324_s20 = smov 80   ;;  %s4325_s25 = smov 72  }
  0x15   : > { %v3936_v9 = vpack.c.bf16 %v834_v8, %v833_v7  ;;  %v3522_v14 = vld [vmem:[%s701_s29] ss:$0 sm:$0xff]  ;;  %s4326_s26 = smov 112   ;;  %s4328_s29 = smov 56  }
  0x16   : > { %3934 = vmatpush3.bf16.msra.mxu1 %v3933_v6  ;;  %s4331_s23 = smov 8  }
  0x17   : > { %3935 = vmatprep.subr.bf16.mxu1 %v4319_v1 }
  0x1a   : > { %3937 = vmatpush3.bf16.msra.mxu1 %v3936_v9 }
  0x1b   : > { %3901 = vmatprep.subr.mxu1 %v4317_v0 }
  0xe6   : > { %v827_v11 = vpop.f32.mrb[0].mxu0 }
  0xe7   : > { %v4460_v12 = vadd.f32 %v3519_v10, %v827_v11  ;;  %v3869_v13 = vpop.f32.mrb[1].mxu0 }
  0xe9   : > { %3879 = vmatmul.mubr.msk.f32.vlgmr.msra.gmra.mrb[0].mxu1 %vm842_vm3, %v4460_v12 }
  0xea   : > { %3903 = vmatprep.mubr.msk.f32.mxu1 %vm4318_vm0, %v4317_v0 }
 0x1bc   : > { %v912_v15 = vpop.f32.mrb[0].mxu1 }
 0x1bd   : > { %v4470_v16 = vadd.f32 %v3522_v14, %v912_v15  ;;  %v3880_v17 = vpop.f32.mrb[1].mxu1 }
 0x1bf   : > { %1007 = vrot.lane.b32.xlu1 %v4470_v16, %s4320_s30  ;;  %917 = vrot.lane.b32.xlu0 %v4470_v16, %s4321_s0  ;;  %s4329_s30 = smov 48   ;;  %s4330_s0 = smov 40  }
 0x1c3   : > { %1085 = vrot.lane.b32.xlu1 %v4470_v16, %s4322_s18 }
 0x1c7   : > { %1083 = vrot.lane.b32.xlu1 %v4470_v16, %s4323_s19 }
 0x1cb   : > { %1252 = vrot.lane.b32.xlu1 %v4470_v16, %s4324_s20  ;;  %s706_s20 = scalar_lea.vmem %s5037_s6, %s3553_s17  ;;  %s4333_s17 = smov 24  }
 0x231   : > { %v1008_v18 = vpop.permute.xlu1 %1007  ;;  %v918_v19 = vpop.permute.xlu0 %917 }
 0x232   : > { %3882 = vmatpush3.xpose.msk.msra.mxu0 %vm919_vm4, %v918_v19 }
 0x233   : > { %3886 = vmatprep.subr.mxu0 %v4317_v0 }
 0x235   : > { %v1086_v20 = vpop.permute.xlu1 %1085  ;;  %3884 = vmatmul.mubr.msk.f32.vlgmr.msra.gmra.mrb[2].mxu0 %vm919_vm4, %v4470_v16 }
 0x236   : > { %3887 = vmatpush3.msra.mxu0 %v1008_v18  ;;  %3888 = vmatprep.mubr.msk.f32.mxu0 %vm4318_vm0, %v4317_v0 }
 0x237   : > { %3891 = vmatprep.subr.mxu0 %v4317_v0 }
 0x239   : > { %v1084_v21 = vpop.permute.xlu1 %1083 }
 0x23d   : > { %v1253_v22 = vpop.permute.xlu1 %1252 }
 0x23e   : > { %3902 = vmatpush3.xpose.msk.msra.mxu1 %vm919_vm4, %v1253_v22 }
 0x23f   : > { %3911 = vmatprep.subr.mxu1 %v4317_v0 }
 0x308   : > { %v990_v23 = vpop.f32.mrb[2].mxu0 }
 0x309   : > { %v994_v25 = vmul.f32 0.35355338, %v990_v23  ;;  %v3885_v26 = vpop.f32.mrb[3].mxu0  ;;  %v1601_v23 = vld [vmem:[%s706_s20] sm:$0xff] }
 0x30a   : > { %v1603_v26 = vld [vmem:[%s706_s20 + $0x10] sm:$0xff] }
 0x30b   : > { %v995_v27 = vadd.f32 %v994_v25, %v743_v24 }
 0x30d   : > { %v996_v28 = vsel %vm919_vm4, %v995_v27, -inf }
 0x30e   : > { %997 = vmax.xlane.f32.xlu0 %v996_v28 }
 0x324   : > { %1419 = vrot.lane.b32.xlu0 %v4470_v16, %s4325_s25  ;;  %s715_s25 = scalar_lea.vmem %s5040_s9, %s5051_s22 }
 0x39b   : > { %v998_v29 = vpop.xlane.xlu0 %997 }
 0x39c   : > { %v999_v30 = vsub.f32 %v995_v27, %v998_v29  ;;  %v1604_v27 = vld [vmem:[%s706_s20 + $0x18] sm:$0xff] }
 0x39d   : > { %v3942_v28 = vpack.c.bf16 %v1604_v27, %v1603_v26 }
 0x39e   : > { %v1000_v31 = vmul.f32 1.442695, %v999_v30 }
 0x39f   : > { %v1420_v36 = vpop.permute.xlu0 %1419 }
 0x3a0   : > { %4289 = vpow2.f32 %v1000_v31 }
 0x3aa   : > { %v4290_v32 = vpop.eup %4289 }
 0x3ab   : > { %v1002_v33 = vsel %vm919_vm4, %v4290_v32, 0.0 }
 0x3ac   : > { %1003 = vadd.xlane.f32.xlu1 %v1002_v33 }
 0x3bd   : > { %1250 = vrot.lane.b32.xlu1 %v4470_v16, %s4326_s26  ;;  %s3556_s26 = sshll.u32 %s5051_s22, 11 }
 0x3c1   : > { %1417 = vrot.lane.b32.xlu1 %v4470_v16, %s4327_s28  ;;  %s709_s28 = scalar_lea.vmem %s5038_s7, %s5051_s22 }
 0x439   : > { %v1004_v34 = vpop.xlane.xlu1 %1003 }
 0x43a   : > { %4291 = vrcp.f32 %v1004_v34 }
 0x43d   : > { %v1251_v35 = vpop.permute.xlu1 %1250 }
 0x43e   : > { %3904 = vmatmul.mubr.msk.f32.vlgmr.msra.gmra.mrb[2].mxu1 %vm919_vm4, %v1251_v35 }
 0x43f   : > { %3912 = vmatpush3.xpose.msk.msra.mxu1 %vm919_vm4, %v1420_v36  ;;  %3913 = vmatprep.mubr.msk.f32.mxu1 %vm4318_vm0, %v4317_v0 }
 0x440   : > { %3938 = vmatprep.subr.bf16.mxu1 %v4319_v1 }
 0x441   : > { %v1418_v37 = vpop.permute.xlu1 %1417 }
 0x442   : > { %3914 = vmatmul.mubr.msk.f32.vlgmr.msra.gmra.mrb[4].mxu1 %vm919_vm4, %v1418_v37 }
 0x443   : > { %3929 = vmatprep.mubr.msk.f32.mxu1 %vm4318_vm0, %v4317_v0 }
 0x444   : > { %v4292_v38 = vpop.eup %4291 }
 0x445   : > { %v1006_v39 = vmul.f32 %v4292_v38, %v4290_v32 }
 0x447   : > { %3889 = vmatmul.mubr.msk.f32.vlgmr.msra.gmra.mrb[4].mxu0 %vm919_vm4, %v1006_v39 }
 0x448   : > { %3892 = vmatpush3.xpose.msk.msra.mxu0 %vm919_vm4, %v1086_v20  ;;  %3893 = vmatprep.mubr.msk.f32.mxu0 %vm4318_vm0, %v4317_v0 }
 0x449   : > { %3896 = vmatprep.subr.mxu0 %v4317_v0 }
 0x44b   : > { %3894 = vmatmul.mubr.msk.f32.vlgmr.msra.gmra.mrb[6].mxu0 %vm919_vm4, %v1084_v21 }
 0x44c   : > { %3898 = vmatprep.mubr.msk.f32.mxu0 %vm4318_vm0, %v4317_v0 }
 0x511   : > { %v1324_v40 = vpop.f32.mrb[2].mxu1 }
 0x512   : > { %v1328_v41 = vmul.f32 0.35355338, %v1324_v40  ;;  %v3905_v42 = vpop.f32.mrb[3].mxu1  ;;  %v3536_v40 = vld [vmem:[%s709_s28] ss:$0 sm:$0xff]  ;;  %s735_s28 = scalar_lea.vmem %s5045_s14, %s5051_s22 }
 0x514   : > { %v1329_v43 = vadd.f32 %v1328_v41, %v743_v24 }
 0x515   : > { %v1491_v44 = vpop.f32.mrb[4].mxu1 }
 0x516   : > { %v3915_v45 = vpop.f32.mrb[5].mxu1  ;;  %v1330_v46 = vsel %vm919_vm4, %v1329_v43, -inf  ;;  %v1495_v50 = vmul.f32 0.35355338, %v1491_v44 }
 0x517   : > { %1331 = vmax.xlane.f32.xlu0 %v1330_v46 }
 0x518   : > { %v1496_v55 = vadd.f32 %v1495_v50, %v743_v24 }
 0x51a   : > { %v4511_v47 = vpop.f32.mrb[4].mxu0  ;;  %v1497_v56 = vsel %vm919_vm4, %v1496_v55, -inf }
 0x51b   : > { %v3890_v48 = vpop.f32.mrb[5].mxu0 }
 0x51e   : > { %v1157_v49 = vpop.f32.mrb[6].mxu0 }
 0x51f   : > { %v1161_v51 = vmul.f32 0.35355338, %v1157_v49  ;;  %v3895_v52 = vpop.f32.mrb[7].mxu0 }
 0x521   : > { %v1162_v53 = vadd.f32 %v1161_v51, %v743_v24  ;;  %v1602_v24 = vld [vmem:[%s706_s20 + $0x8] sm:$0xff] }
 0x522   : > { %v3939_v25 = vpack.c.bf16 %v1602_v24, %v1601_v23  ;;  %v3539_v24 = vld [vmem:[%s715_s25] ss:$0 sm:$0xff] }
 0x523   : > { %v1163_v54 = vsel %vm919_vm4, %v1162_v53, -inf }
 0x524   : > { %1164 = vmax.xlane.f32.xlu1 %v1163_v54  ;;  %3940 = vmatpush3.bf16.msra.mxu1 %v3939_v25 }
 0x525   : > { %3941 = vmatprep.subr.bf16.mxu1 %v4319_v1 }
 0x528   : > { %1498 = vmax.xlane.f32.xlu1 %v1497_v56  ;;  %3943 = vmatpush3.bf16.msra.mxu1 %v3942_v28 }
 0x5a4   : > { %v1332_v57 = vpop.xlane.xlu0 %1331 }
 0x5a5   : > { %v1333_v58 = vsub.f32 %v1329_v43, %v1332_v57 }
 0x5a7   : > { %v1334_v59 = vmul.f32 1.442695, %v1333_v58 }
 0x5a9   : > { %4293 = vpow2.f32 %v1334_v59 }
 0x5b1   : > { %v1165_v60 = vpop.xlane.xlu1 %1164 }
 0x5b2   : > { %v1166_v6 = vsub.f32 %v1162_v53, %v1165_v60 }
 0x5b3   : > { %v4294_v61 = vpop.eup %4293 }
 0x5b4   : > { %v1336_v62 = vsel %vm919_vm4, %v4294_v61, 0.0  ;;  %v1167_v7 = vmul.f32 1.442695, %v1166_v6 }
 0x5b5   : > { %1337 = vadd.xlane.f32.xlu1 %v1336_v62  ;;  %v1499_v63 = vpop.xlane.xlu1 %1498 }
 0x5b6   : > { %v1500_v2 = vsub.f32 %v1496_v55, %v1499_v63 }
 0x5b8   : > { %v1501_v3 = vmul.f32 1.442695, %v1500_v2 }
 0x5ba   : > { %4295 = vpow2.f32 %v1501_v3 }
 0x5bb   : > { %4297 = vpow2.f32 %v1167_v7 }
 0x5c4   : > { %v4296_v4 = vpop.eup %4295 }
 0x5c5   : > { %v1503_v5 = vsel %vm919_vm4, %v4296_v4, 0.0  ;;  %v4298_v8 = vpop.eup %4297 }
 0x5c6   : > { %1174 = vrot.lane.b32.xlu1 %v4470_v16, %s4328_s29  ;;  %1504 = vadd.xlane.f32.xlu0 %v1503_v5  ;;  %v1169_v9 = vsel %vm919_vm4, %v4298_v8, 0.0  ;;  %s3555_s29 = sshll.u32 %s5051_s22, 9 }
 0x5c7   : > { %s4552_s18 = scalar_lea.vmem %s5041_s10, %s3555_s29 }
 0x5c8   : > { %v1733_v51 = vld [vmem:[%s4552_s18 + $0x88] sm:$0xff]  ;;  %v1719_v52 = vld [vmem:[%s4552_s18 + $0x18] sm:$0xff]  ;;  %v1716_v55 = vld [vmem:[%s4552_s18] sm:$0xff] }
 0x5c9   : > { %v1735_v54 = vld [vmem:[%s4552_s18 + $0x98] sm:$0xff]  ;;  %v1732_v56 = vld [vmem:[%s4552_s18 + $0x80] sm:$0xff]  ;;  %v1718_v59 = vld [vmem:[%s4552_s18 + $0x10] sm:$0xff] }
 0x5ca   : > { %v3952_v57 = vpack.c.bf16 %v1735_v54, %v1719_v52  ;;  %v3946_v58 = vpack.c.bf16 %v1732_v56, %v1716_v55  ;;  %v1734_v60 = vld [vmem:[%s4552_s18 + $0x90] sm:$0xff]  ;;  %v1749_v62 = vld [vmem:[%s4552_s18 + $0x108] sm:$0xff]  ;;  %v1751_v2 = vld [vmem:[%s4552_s18 + $0x118] sm:$0xff] }
 0x5cb   : > { %v1765_v63 = vld [vmem:[%s4552_s18 + $0x188] sm:$0xff]  ;;  %v1748_v5 = vld [vmem:[%s4552_s18 + $0x100] sm:$0xff]  ;;  %v1722_v28 = vld [vmem:[%s4552_s18 + $0x30] sm:$0xff] }
 0x5cc   : > { %3953 = vmatprep.subr.bf16.mxu1 %v3952_v57  ;;  %v3948_v3 = vpack.c.bf16 %v1765_v63, %v1749_v62  ;;  %v1764_v6 = vld [vmem:[%s4552_s18 + $0x180] sm:$0xff]  ;;  %v1726_v52 = vld [vmem:[%s4552_s18 + $0x50] sm:$0xff]  ;;  %v1757_v54 = vld [vmem:[%s4552_s18 + $0x148] sm:$0xff] }
 0x5cd   : > { %v1720_v25 = vld [vmem:[%s4552_s18 + $0x20] sm:$0xff]  ;;  %v1773_v55 = vld [vmem:[%s4552_s18 + $0x1c8] sm:$0xff]  ;;  %v1759_v56 = vld [vmem:[%s4552_s18 + $0x158] sm:$0xff] }
 0x5ce   : > { %v1736_v26 = vld [vmem:[%s4552_s18 + $0xa0] sm:$0xff]  ;;  %v1775_v57 = vld [vmem:[%s4552_s18 + $0x1d8] sm:$0xff]  ;;  %v3980_v62 = vpack.c.bf16 %v1773_v55, %v1757_v54 }
 0x5cf   : > { %v3988_v63 = vpack.c.bf16 %v1775_v57, %v1759_v56 }
 0x5dc   : > { %1341 = vrot.lane.b32.xlu0 %v4470_v16, %s4329_s30  ;;  %s4635_s30 = scalar_lea.vmem %s5043_s12, %s3556_s26 }
 0x5dd   : > { %v2504_v54 = vld [vmem:[%s4635_s30 + $0x1a8] sm:$0xff]  ;;  %v2455_v57 = vld [vmem:[%s4635_s30 + $0x20] sm:$0xff] }
 0x5ea   : > { %1170 = vadd.xlane.f32.xlu1 %v1169_v9  ;;  %v1750_v9 = vld [vmem:[%s4552_s18 + $0x110] sm:$0xff] }
 0x5fb   : > { %1508 = vrot.lane.b32.xlu1 %v4470_v16, %s4330_s0  ;;  %s3515_s0 = sshll.u32 %s5051_s22, 4 }
 0x5fc   : > { %s724_s20 = scalar_lea.vmem %s5042_s11, %s3515_s0  ;;  %s738_s0 = scalar_lea.vmem %s5046_s15, %s5051_s22 }
 0x642   : > { %v1338_v10 = vpop.xlane.xlu1 %1337 }
 0x646   : > { %v1175_v11 = vpop.permute.xlu1 %1174 }
 0x647   : > { %3897 = vmatpush3.msra.mxu0 %v1175_v11 }
 0x648   : > { %3906 = vmatprep.subr.mxu0 %v4317_v0 }
 0x653   : > { %v1505_v14 = vpop.xlane.xlu0 %1504 }
 0x657   : > { %v1342_v19 = vpop.permute.xlu0 %1341 }
 0x677   : > { %v1171_v13 = vpop.xlane.xlu1 %1170 }
 0x678   : > { %4299 = vrcp.f32 %v1171_v13  ;;  %v1721_v13 = vld [vmem:[%s4552_s18 + $0x28] sm:$0xff] }
 0x679   : > { %4301 = vrcp.f32 %v1338_v10  ;;  %v1766_v10 = vld [vmem:[%s4552_s18 + $0x190] sm:$0xff] }
 0x67a   : > { %4303 = vrcp.f32 %v1505_v14  ;;  %v3958_v11 = vpack.c.bf16 %v1766_v10, %v1750_v9  ;;  %v1737_v14 = vld [vmem:[%s4552_s18 + $0xa8] sm:$0xff]  ;;  %v1728_v10 = vld [vmem:[%s4552_s18 + $0x60] sm:$0xff] }
 0x67b   : > { %v1509_v21 = vpop.permute.xlu1 %1508 }
 0x682   : > { %v4300_v15 = vpop.eup %4299 }
 0x683   : > { %v1173_v17 = vmul.f32 %v4300_v15, %v4298_v8  ;;  %v4302_v18 = vpop.eup %4301  ;;  %v3950_v8 = vpack.c.bf16 %v1764_v6, %v1748_v5  ;;  %v1723_v15 = vld [vmem:[%s4552_s18 + $0x38] sm:$0xff]  ;;  %v1745_v5 = vld [vmem:[%s4552_s18 + $0xe8] sm:$0xff] }
 0x684   : > { %v1340_v16 = vmul.f32 %v4302_v18, %v4294_v61  ;;  %v4304_v20 = vpop.eup %4303  ;;  %v3954_v61 = vpack.c.bf16 %v1734_v60, %v1718_v59  ;;  %v1739_v18 = vld [vmem:[%s4552_s18 + $0xb8] sm:$0xff]  ;;  %v1756_v60 = vld [vmem:[%s4552_s18 + $0x140] sm:$0xff] }
 0x685   : > { %3899 = vmatmul.mubr.msk.f32.vlgmr.msra.gmra.mrb[8].mxu0 %vm919_vm4, %v1173_v17  ;;  %v1507_v22 = vmul.f32 %v4304_v20, %v4296_v4  ;;  %v1767_v4 = vld [vmem:[%s4552_s18 + $0x198] sm:$0xff]  ;;  %v3960_v17 = vpack.c.bf16 %v1737_v14, %v1721_v13 }
 0x686   : > { %3907 = vmatpush3.msra.mxu0 %v1342_v19  ;;  %3908 = vmatprep.mubr.msk.f32.mxu0 %vm4318_vm0, %v4317_v0  ;;  %v3956_v7 = vpack.c.bf16 %v1767_v4, %v1751_v2  ;;  %v3968_v19 = vpack.c.bf16 %v1739_v18, %v1723_v15  ;;  %v1758_v2 = vld [vmem:[%s4552_s18 + $0x150] sm:$0xff]  ;;  %v1729_v4 = vld [vmem:[%s4552_s18 + $0x68] sm:$0xff]  ;;  %v1731_v6 = vld [vmem:[%s4552_s18 + $0x78] sm:$0xff] }
 0x687   : > { %3916 = vmatprep.subr.mxu0 %v4317_v0  ;;  %v3992_v13 = vpack.c.bf16 %v1745_v5, %v1729_v4  ;;  %v1730_v15 = vld [vmem:[%s4552_s18 + $0x70] sm:$0xff]  ;;  %v1761_v18 = vld [vmem:[%s4552_s18 + $0x168] sm:$0xff]  ;;  %v2506_v4 = vld [vmem:[%s4635_s30 + $0x1b8] sm:$0xff] }
 0x689   : > { %3909 = vmatmul.mubr.msk.f32.vlgmr.msra.gmra.mrb[10].mxu0 %vm919_vm4, %v1340_v16 }
 0x68a   : > { %3917 = vmatpush3.msra.mxu0 %v1509_v21  ;;  %3918 = vmatprep.mubr.msk.f32.mxu0 %vm4318_vm0, %v4317_v0 }
 0x68d   : > { %3919 = vmatmul.mubr.msk.f32.vlgmr.msra.gmra.mrb[12].mxu0 %vm919_vm4, %v1507_v22 }
 0x68e   : > { %1931 = vmatprep.mubr.f32.mxu0 %v4317_v0 }
 0x758   : > { %v1246_v29 = vpop.f32.mrb[8].mxu0 }
 0x759   : > { %1585 = vrot.lane.b32.xlu1 %v1246_v29, %s4331_s23  ;;  %v3900_v30 = vpop.f32.mrb[9].mxu0  ;;  %s712_s23 = scalar_lea.vmem %s5039_s8, %s5051_s22  ;;  %v1738_v29 = vld [vmem:[%s4552_s18 + $0xb0] sm:$0xff] }
 0x75a   : > { %v3538_v22 = vld [vmem:[%s712_s23] ss:$0 sm:$0xff]  ;;  %v1753_v30 = vld [vmem:[%s4552_s18 + $0x128] sm:$0xff] }
 0x75c   : > { %v1413_v31 = vpop.f32.mrb[10].mxu0 }
 0x75d   : > { %1589 = vrot.lane.b32.xlu0 %v1413_v31, %s4332_s24  ;;  %v3910_v32 = vpop.f32.mrb[11].mxu0  ;;  %v1769_v31 = vld [vmem:[%s4552_s18 + $0x1a8] sm:$0xff] }
 0x75e   : > { %v1755_v32 = vld [vmem:[%s4552_s18 + $0x138] sm:$0xff] }
 0x760   : > { %v1580_v33 = vpop.f32.mrb[12].mxu0 }
 0x761   : > { %1593 = vrot.lane.b32.xlu1 %v1580_v33, %s4333_s17  ;;  %v3920_v34 = vpop.f32.mrb[13].mxu0  ;;  %v1771_v33 = vld [vmem:[%s4552_s18 + $0x1b8] sm:$0xff]  ;;  %s732_s17 = scalar_lea.vmem %s5044_s13, %s5051_s22 }
 0x7cb   : > { %v1586_v35 = vpop.permute.xlu1 %1585 }
 0x7cc   : > { %v1596_v36 = vsel %vm919_vm4, %v4511_v47, %v1586_v35  ;;  %v3962_v35 = vpack.c.bf16 %v1736_v26, %v1720_v25 }
 0x7cf   : > { %v1590_v1 = vpop.permute.xlu0 %1589 }
 0x7d0   : > { %v1598_v37 = vsel %vm1597_vm5, %v1596_v36, %v1590_v1  ;;  %v3970_v1 = vpack.c.bf16 %v1738_v29, %v1722_v28  ;;  %v1752_v36 = vld [vmem:[%s4552_s18 + $0x120] sm:$0xff]  ;;  %v1778_v28 = vld [vmem:[%s4552_s18 + $0x1f0] sm:$0xff] }
 0x7d1   : > { %v2467_v29 = vld [vmem:[%s4635_s30 + $0x80] sm:$0xff] }
 0x7d3   : > { %v1594_v38 = vpop.permute.xlu1 %1593 }
 0x7d4   : > { %v1600_v39 = vsel %vm1599_vm6, %v1598_v37, %v1594_v38  ;;  %v1768_v37 = vld [vmem:[%s4552_s18 + $0x1a0] sm:$0xff] }
 0x7d5   : > { %3930 = vmatmul.mubr.msk.f32.vlgmr.msra.gmra.mrb[6].mxu1 %vm842_vm3, %v1600_v39  ;;  %v3964_v39 = vpack.c.bf16 %v1769_v31, %v1753_v30  ;;  %v2468_v30 = vld [vmem:[%s4635_s30 + $0x88] sm:$0xff]  ;;  %v2499_v31 = vld [vmem:[%s4635_s30 + $0x180] sm:$0xff] }
 0x7d6   : > { %2002 = vmatprep.mubr.f32.mxu1 %v4317_v0  ;;  %3955 = vmatpush1.bf16.msra.mxu1 %v3954_v61  ;;  %v1772_v61 = vld [vmem:[%s4552_s18 + $0x1c0] sm:$0xff] }
 0x7d7   : > { %3957 = vmatprep.subr.bf16.mxu1 %v3956_v7  ;;  %v1747_v7 = vld [vmem:[%s4552_s18 + $0xf8] sm:$0xff] }
 0x7d8   : > { %v4000_v14 = vpack.c.bf16 %v1747_v7, %v1731_v6  ;;  %v2457_v7 = vld [vmem:[%s4635_s30 + $0x30] sm:$0xff] }
 0x7da   : > { %3959 = vmatpush1.bf16.msra.mxu1 %v3958_v11  ;;  %v1744_v11 = vld [vmem:[%s4552_s18 + $0xe0] sm:$0xff] }
 0x7db   : > { %3969 = vmatprep.subr.bf16.mxu1 %v3968_v19  ;;  %v1777_v19 = vld [vmem:[%s4552_s18 + $0x1e8] sm:$0xff] }
 0x7dc   : > { %v3996_v25 = vpack.c.bf16 %v1777_v19, %v1761_v18  ;;  %v2508_v18 = vld [vmem:[%s4635_s30 + $0x1c8] sm:$0xff] }
 0x8a8   : > { %v1681_v41 = vpop.f32.mrb[6].mxu1 }
 0x8a9   : > { %v1682_v42 = vadd.f32 %v3536_v40, %v1681_v41  ;;  %v3931_v43 = vpop.f32.mrb[7].mxu1  ;;  %v3972_v40 = vpack.c.bf16 %v1771_v33, %v1755_v32  ;;  %v1754_v41 = vld [vmem:[%s4552_s18 + $0x130] sm:$0xff]  ;;  %v2500_v32 = vld [vmem:[%s4635_s30 + $0x188] sm:$0xff] }
 0x8aa   : > { %v1725_v43 = vld [vmem:[%s4552_s18 + $0x48] sm:$0xff] }
 0x8ab   : > { %v1685_v44 = vadd.f32 %v1682_v42, %v4460_v12  ;;  %v1717_v12 = vld [vmem:[%s4552_s18 + $0x8] sm:$0xff]  ;;  %v1770_v42 = vld [vmem:[%s4552_s18 + $0x1b0] sm:$0xff] }
 0x8ac   : > { %v3944_v53 = vpack.c.bf16 %v1733_v51, %v1717_v12 }
 0x8ad   : > { %v1686_v45 = vsel %vm842_vm3, %v1685_v44, 0.0 }
 0x8ae   : > { %1687 = vadd.xlane.f32.xlu0 %v1686_v45  ;;  %3945 = vmatprep.subr.bf16.mxu0 %v3944_v53  ;;  %v1727_v45 = vld [vmem:[%s4552_s18 + $0x58] sm:$0xff]  ;;  %v1742_v53 = vld [vmem:[%s4552_s18 + $0xd0] sm:$0xff] }
 0x8af   : > { %3947 = vmatpush1.bf16.msra.mxu0 %v3946_v58  ;;  %v3986_v59 = vpack.c.bf16 %v1742_v53, %v1726_v52  ;;  %v2472_v52 = vld [vmem:[%s4635_s30 + $0xa8] sm:$0xff]  ;;  %v2503_v53 = vld [vmem:[%s4635_s30 + $0x1a0] sm:$0xff] }
 0x8b0   : > { %3949 = vmatprep.subr.bf16.mxu0 %v3948_v3  ;;  %v1774_v3 = vld [vmem:[%s4552_s18 + $0x1d0] sm:$0xff] }
 0x8b1   : > { %v3990_v9 = vpack.c.bf16 %v1774_v3, %v1758_v2  ;;  %v2474_v2 = vld [vmem:[%s4635_s30 + $0xb8] sm:$0xff]  ;;  %v2505_v3 = vld [vmem:[%s4635_s30 + $0x1b0] sm:$0xff] }
 0x8b3   : > { %3951 = vmatpush1.bf16.msra.mxu0 %v3950_v8  ;;  %v3982_v8 = vpack.c.bf16 %v1772_v61, %v1756_v60  ;;  %v4048_v60 = vpack.c.bf16 %v2504_v54, %v2503_v53  ;;  %v2487_v61 = vld [vmem:[%s4635_s30 + $0x120] sm:$0xff]  ;;  %v2514_v54 = vld [vmem:[%s4635_s30 + $0x1f8] sm:$0xff] }
 0x8b4   : > { %3961 = vmatprep.subr.bf16.mxu0 %v3960_v17  ;;  %v1746_v17 = vld [vmem:[%s4552_s18 + $0xf0] sm:$0xff] }
 0x93b   : > { %v1688_v46 = vpop.xlane.xlu0 %1687 }
 0x93c   : > { %v1690_v47 = vmul.f32 0.03125, %v1688_v46  ;;  %v1743_v46 = vld [vmem:[%s4552_s18 + $0xd8] sm:$0xff] }
 0x93d   : > { %v3984_v51 = vpack.c.bf16 %v1743_v46, %v1727_v45 }
 0x93e   : > { %v1691_v48 = vsub.f32 %v1685_v44, %v1690_v47  ;;  %v1741_v44 = vld [vmem:[%s4552_s18 + $0xc8] sm:$0xff]  ;;  %v3966_v47 = vpack.c.bf16 %v1768_v37, %v1752_v36  ;;  %v4008_v36 = vpack.c.bf16 %v2468_v30, %v2467_v29  ;;  %v4040_v37 = vpack.c.bf16 %v2500_v32, %v2499_v31  ;;  %v2510_v29 = vld [vmem:[%s4635_s30 + $0x1d8] sm:$0xff]  ;;  %v2461_v32 = vld [vmem:[%s4635_s30 + $0x50] sm:$0xff] }
 0x93f   : > { %v3976_v12 = vpack.c.bf16 %v1741_v44, %v1725_v43  ;;  %v2501_v43 = vld [vmem:[%s4635_s30 + $0x190] sm:$0xff]  ;;  %v2502_v44 = vld [vmem:[%s4635_s30 + $0x198] sm:$0xff] }
 0x940   : > { %v1692_v49 = vmul.f32 %v1691_v48, %v1691_v48 }
 0x942   : > { %v1693_v50 = vsel %vm842_vm3, %v1692_v49, 0.0  ;;  %v1724_v49 = vld [vmem:[%s4552_s18 + $0x40] sm:$0xff] }
 0x943   : > { %1694 = vadd.xlane.f32.xlu1 %v1693_v50  ;;  %v1740_v50 = vld [vmem:[%s4552_s18 + $0xc0] sm:$0xff] }
 0x944   : > { %v3978_v58 = vpack.c.bf16 %v1740_v50, %v1724_v49  ;;  %v4044_v50 = vpack.c.bf16 %v2502_v44, %v2501_v43  ;;  %v2463_v44 = vld [vmem:[%s4635_s30 + $0x60] sm:$0xff] }
 0x9d0   : > { %v1695_v16 = vpop.xlane.xlu1 %1694 }
 0x9d1   : > { %v1696_v20 = vmul.f32 0.03125, %v1695_v16  ;;  %v1763_v16 = vld [vmem:[%s4552_s18 + $0x178] sm:$0xff] }
 0x9d3   : > { %v1697_v21 = vadd.f32 1e-05, %v1696_v20  ;;  %v1779_v20 = vld [vmem:[%s4552_s18 + $0x1f8] sm:$0xff] }
 0x9d4   : > { %v4004_v26 = vpack.c.bf16 %v1779_v20, %v1763_v16  ;;  %v2459_v20 = vld [vmem:[%s4635_s30 + $0x40] sm:$0xff] }
 0x9d5   : > { %4305 = vrsqrt.f32 %v1697_v21  ;;  %v3994_v21 = vpack.c.bf16 %v1744_v11, %v1728_v10  ;;  %v4052_v10 = vpack.c.bf16 %v2506_v4, %v2505_v3  ;;  %v2489_v11 = vld [vmem:[%s4635_s30 + $0x130] sm:$0xff]  ;;  %v2564_v4 = vld [vmem:[%s4635_s30 + $0x388] sm:$0xff] }
 0x9df   : > { %v4306_v23 = vpop.eup %4305 }
 0x9e0   : > { %v1699_v27 = vmul.f32 %v4306_v23, %v1691_v48  ;;  %v3974_v48 = vpack.c.bf16 %v1770_v42, %v1754_v41  ;;  %v1760_v23 = vld [vmem:[%s4552_s18 + $0x160] sm:$0xff]  ;;  %v2469_v41 = vld [vmem:[%s4635_s30 + $0x90] sm:$0xff]  ;;  %v2470_v42 = vld [vmem:[%s4635_s30 + $0x98] sm:$0xff] }
 0x9e1   : > { %v4012_v49 = vpack.c.bf16 %v2470_v42, %v2469_v41  ;;  %v2512_v41 = vld [vmem:[%s4635_s30 + $0x1e8] sm:$0xff] }
 0x9e2   : > { %v1707_v34 = vmul.f32 %v3538_v22, %v1699_v27  ;;  %v4002_v22 = vpack.c.bf16 %v1746_v17, %v1730_v15  ;;  %v1762_v27 = vld [vmem:[%s4552_s18 + $0x170] sm:$0xff]  ;;  %v2476_v15 = vld [vmem:[%s4635_s30 + $0xc8] sm:$0xff]  ;;  %v2507_v17 = vld [vmem:[%s4635_s30 + $0x1c0] sm:$0xff] }
 0x9e4   : > { %v4592_v38 = vadd.f32 %v3539_v24, %v1707_v34  ;;  %v1776_v24 = vld [vmem:[%s4552_s18 + $0x1e0] sm:$0xff]  ;;  %v4006_v34 = vpack.c.bf16 %v1778_v28, %v1762_v27  ;;  %v2478_v27 = vld [vmem:[%s4635_s30 + $0xd8] sm:$0xff]  ;;  %v2509_v28 = vld [vmem:[%s4635_s30 + $0x1d0] sm:$0xff] }
 0x9e5   : > { %v3998_v33 = vpack.c.bf16 %v1776_v24, %v1760_v23  ;;  %v4056_v23 = vpack.c.bf16 %v2508_v18, %v2507_v17  ;;  %v2491_v24 = vld [vmem:[%s4635_s30 + $0x140] sm:$0xff] }
 0x9e6   : > { %3540 = vmatmul.mubr.msk.f32.vlgmr.msra.gmra.mrb[14].mxu0 %vm842_vm3, %v4592_v38  ;;  %3541 = vmatmul.mubr.msk.f32.vlgmr.msra.gmra.mrb[8].mxu1 %vm842_vm3, %v4592_v38 }
 0x9e7   : > { %3963 = vmatpush1.bf16.msra.mxu0 %v3962_v35  ;;  %3971 = vmatpush1.bf16.msra.mxu1 %v3970_v1  ;;  %v2451_v35 = vld [vmem:[%s4635_s30] sm:$0xff]  ;;  %v2452_v1 = vld [vmem:[%s4635_s30 + $0x8] sm:$0xff] }
 0x9e8   : > { %3965 = vmatprep.subr.bf16.mxu0 %v3964_v39  ;;  %3973 = vmatprep.subr.bf16.mxu1 %v3972_v40  ;;  %v2483_v39 = vld [vmem:[%s4635_s30 + $0x100] sm:$0xff]  ;;  %v2484_v40 = vld [vmem:[%s4635_s30 + $0x108] sm:$0xff]  ;;  %v4010_v45 = vpack.c.bf16 %v2452_v1, %v2451_v35  ;;  %v4060_v35 = vpack.c.bf16 %v2510_v29, %v2509_v28  ;;  %v2493_v1 = vld [vmem:[%s4635_s30 + $0x150] sm:$0xff] }
 0x9e9   : > { %2073 = vmatprep.mubr.f32.mxu0 %v4317_v0  ;;  %2144 = vmatprep.mubr.f32.mxu1 %v4317_v0  ;;  %v4042_v46 = vpack.c.bf16 %v2484_v40, %v2483_v39  ;;  %v2480_v39 = vld [vmem:[%s4635_s30 + $0xe8] sm:$0xff]  ;;  %v2511_v40 = vld [vmem:[%s4635_s30 + $0x1e0] sm:$0xff] }
 0x9ea   : > { %v2547_v29 = vld [vmem:[%s4635_s30 + $0x300] sm:$0xff] }
 0x9eb   : > { %3967 = vmatpush1.bf16.msra.mxu0 %v3966_v47  ;;  %3975 = vmatpush1.bf16.msra.mxu1 %v3974_v48  ;;  %v2453_v47 = vld [vmem:[%s4635_s30 + $0x10] sm:$0xff]  ;;  %v2454_v48 = vld [vmem:[%s4635_s30 + $0x18] sm:$0xff] }
 0x9ec   : > { %3977 = vmatprep.subr.bf16.mxu0 %v3976_v12  ;;  %3985 = vmatprep.subr.bf16.mxu1 %v3984_v51  ;;  %v2486_v12 = vld [vmem:[%s4635_s30 + $0x118] sm:$0xff]  ;;  %v2471_v51 = vld [vmem:[%s4635_s30 + $0xa0] sm:$0xff]  ;;  %v4014_v55 = vpack.c.bf16 %v2454_v48, %v2453_v47  ;;  %v2464_v47 = vld [vmem:[%s4635_s30 + $0x68] sm:$0xff] }
 0x9ed   : > { %v2495_v48 = vld [vmem:[%s4635_s30 + $0x160] sm:$0xff] }
 0x9ee   : > { %3542 = vmatmul.mubr.msk.f32.vlgmr.msra.gmra.mrb[16].mxu0 %vm842_vm3, %v4592_v38  ;;  %3543 = vmatmul.mubr.msk.f32.vlgmr.msra.gmra.mrb[10].mxu1 %vm842_vm3, %v4592_v38 }
 0x9ef   : > { %3979 = vmatpush1.bf16.msra.mxu0 %v3978_v58  ;;  %3987 = vmatpush1.bf16.msra.mxu1 %v3986_v59  ;;  %v2456_v58 = vld [vmem:[%s4635_s30 + $0x28] sm:$0xff]  ;;  %v4016_v59 = vpack.c.bf16 %v2472_v52, %v2471_v51  ;;  %v2482_v51 = vld [vmem:[%s4635_s30 + $0xf8] sm:$0xff]  ;;  %v2513_v52 = vld [vmem:[%s4635_s30 + $0x1f0] sm:$0xff] }
 0x9f0   : > { %3981 = vmatprep.subr.bf16.mxu0 %v3980_v62  ;;  %3989 = vmatprep.subr.bf16.mxu1 %v3988_v63  ;;  %v2488_v62 = vld [vmem:[%s4635_s30 + $0x128] sm:$0xff]  ;;  %v2473_v63 = vld [vmem:[%s4635_s30 + $0xb0] sm:$0xff]  ;;  %v4018_v5 = vpack.c.bf16 %v2456_v58, %v2455_v57  ;;  %v4068_v57 = vpack.c.bf16 %v2514_v54, %v2513_v52 }
 0x9f1   : > { %2215 = vmatprep.mubr.f32.mxu0 %v4317_v0  ;;  %2286 = vmatprep.mubr.f32.mxu1 %v4317_v0  ;;  %v4050_v6 = vpack.c.bf16 %v2488_v62, %v2487_v61  ;;  %v2531_v62 = vld [vmem:[%s4635_s30 + $0x280] sm:$0xff]  ;;  %v2536_v52 = vld [vmem:[%s4635_s30 + $0x2a8] sm:$0xff] }
 0x9f2   : > { %v2568_v54 = vld [vmem:[%s4635_s30 + $0x3a8] sm:$0xff] }
 0x9f3   : > { %3983 = vmatpush1.bf16.msra.mxu0 %v3982_v8  ;;  %3991 = vmatpush1.bf16.msra.mxu1 %v3990_v9  ;;  %v2458_v8 = vld [vmem:[%s4635_s30 + $0x38] sm:$0xff]  ;;  %v4020_v9 = vpack.c.bf16 %v2474_v2, %v2473_v63  ;;  %v2532_v63 = vld [vmem:[%s4635_s30 + $0x288] sm:$0xff]  ;;  %v2563_v2 = vld [vmem:[%s4635_s30 + $0x380] sm:$0xff] }
 0x9f4   : > { %3993 = vmatprep.subr.bf16.mxu0 %v3992_v13  ;;  %4001 = vmatprep.subr.bf16.mxu1 %v4000_v14  ;;  %v2490_v13 = vld [vmem:[%s4635_s30 + $0x138] sm:$0xff]  ;;  %v2475_v14 = vld [vmem:[%s4635_s30 + $0xc0] sm:$0xff]  ;;  %v4022_v19 = vpack.c.bf16 %v2458_v8, %v2457_v7  ;;  %v4072_v3 = vpack.c.bf16 %v2532_v63, %v2531_v62 }
 0x9f5   : > { %v4054_v16 = vpack.c.bf16 %v2490_v13, %v2489_v11 }
 0x9f6   : > { %3544 = vmatmul.mubr.msk.f32.vlgmr.msra.gmra.mrb[18].mxu0 %vm842_vm3, %v4592_v38  ;;  %3545 = vmatmul.mubr.msk.f32.vlgmr.msra.gmra.mrb[12].mxu1 %vm842_vm3, %v4592_v38 }
 0x9f7   : > { %3995 = vmatpush1.bf16.msra.mxu0 %v3994_v21  ;;  %4003 = vmatpush1.bf16.msra.mxu1 %v4002_v22  ;;  %v2460_v21 = vld [vmem:[%s4635_s30 + $0x48] sm:$0xff]  ;;  %v4024_v22 = vpack.c.bf16 %v2476_v15, %v2475_v14  ;;  %v4740_v14 = vld [vmem:[%s724_s20] sm:$0xff] }
 0x9f8   : > { %3997 = vmatprep.subr.bf16.mxu0 %v3996_v25  ;;  %4005 = vmatprep.subr.bf16.mxu1 %v4004_v26  ;;  %v2492_v25 = vld [vmem:[%s4635_s30 + $0x148] sm:$0xff]  ;;  %v2477_v26 = vld [vmem:[%s4635_s30 + $0xd0] sm:$0xff]  ;;  %v4026_v30 = vpack.c.bf16 %v2460_v21, %v2459_v20 }
 0x9f9   : > { %2357 = vmatprep.mubr.f32.mxu0 %v4317_v0  ;;  %2428 = vmatprep.mubr.f32.mxu1 %v4317_v0  ;;  %v2485_v0 = vld [vmem:[%s4635_s30 + $0x110] sm:$0xff]  ;;  %v4058_v31 = vpack.c.bf16 %v2492_v25, %v2491_v24  ;;  %v2516_v24 = vld [vmem:[%s4635_s30 + $0x208] sm:$0xff] }
 0x9fa   : > { %v4046_v56 = vpack.c.bf16 %v2486_v12, %v2485_v0  ;;  %v2481_v12 = vld [vmem:[%s4635_s30 + $0xf0] sm:$0xff] }
 0x9fb   : > { %3999 = vmatpush1.bf16.msra.mxu0 %v3998_v33  ;;  %4007 = vmatpush1.bf16.msra.mxu1 %v4006_v34  ;;  %v2462_v33 = vld [vmem:[%s4635_s30 + $0x58] sm:$0xff]  ;;  %v4028_v34 = vpack.c.bf16 %v2478_v27, %v2477_v26  ;;  %v4036_v53 = vpack.c.bf16 %v2482_v51, %v2481_v12 }
 0x9fc   : > { %4009 = vmatprep.subr.bf16.mxu0 %v4008_v36  ;;  %4041 = vmatprep.subr.bf16.mxu1 %v4040_v37  ;;  %v2494_v36 = vld [vmem:[%s4635_s30 + $0x158] sm:$0xff]  ;;  %v2479_v37 = vld [vmem:[%s4635_s30 + $0xe0] sm:$0xff]  ;;  %v4030_v42 = vpack.c.bf16 %v2462_v33, %v2461_v32 }
 0x9fd   : > { %v4062_v43 = vpack.c.bf16 %v2494_v36, %v2493_v1  ;;  %v2534_v1 = vld [vmem:[%s4635_s30 + $0x298] sm:$0xff]  ;;  %v2565_v36 = vld [vmem:[%s4635_s30 + $0x390] sm:$0xff] }
 0x9fe   : > { %3546 = vmatmul.mubr.msk.f32.vlgmr.msra.gmra.mrb[20].mxu0 %vm842_vm3, %v4592_v38  ;;  %3547 = vmatmul.mubr.msk.f32.vlgmr.msra.gmra.mrb[14].mxu1 %vm842_vm3, %v4592_v38 }
 0x9ff   : > { %4011 = vmatpush3.bf16.msra.mxu0 %v4010_v45  ;;  %4043 = vmatpush3.bf16.msra.mxu1 %v4042_v46  ;;  %v4032_v45 = vpack.c.bf16 %v2480_v39, %v2479_v37  ;;  %v4064_v46 = vpack.c.bf16 %v2512_v41, %v2511_v40  ;;  %v2566_v37 = vld [vmem:[%s4635_s30 + $0x398] sm:$0xff] }
 0xa00   : > { %4013 = vmatprep.subr.bf16.mxu0 %v4012_v49  ;;  %4045 = vmatprep.subr.bf16.mxu1 %v4044_v50  ;;  %v2496_v49 = vld [vmem:[%s4635_s30 + $0x168] sm:$0xff]  ;;  %v4034_v50 = vpack.c.bf16 %v2464_v47, %v2463_v44  ;;  %v2518_v44 = vld [vmem:[%s4635_s30 + $0x218] sm:$0xff] }
 0xa01   : > { %v4066_v0 = vpack.c.bf16 %v2496_v49, %v2495_v48  ;;  %v4108_v48 = vpack.c.bf16 %v2566_v37, %v2565_v36  ;;  %v2549_v49 = vld [vmem:[%s4635_s30 + $0x310] sm:$0xff]  ;;  %v2572_v36 = vld [vmem:[%s4635_s30 + $0x3c8] sm:$0xff] }
 0xa03   : > { %4015 = vmatpush3.bf16.msra.mxu0 %v4014_v55  ;;  %4047 = vmatpush3.bf16.msra.mxu1 %v4046_v56  ;;  %v2465_v55 = vld [vmem:[%s4635_s30 + $0x70] sm:$0xff]  ;;  %v2466_v56 = vld [vmem:[%s4635_s30 + $0x78] sm:$0xff] }
 0xa04   : > { %4017 = vmatprep.subr.bf16.mxu0 %v4016_v59  ;;  %4049 = vmatprep.subr.bf16.mxu1 %v4048_v60  ;;  %v4038_v58 = vpack.c.bf16 %v2466_v56, %v2465_v55  ;;  %v2497_v59 = vld [vmem:[%s4635_s30 + $0x170] sm:$0xff]  ;;  %v2498_v60 = vld [vmem:[%s4635_s30 + $0x178] sm:$0xff] }
 0xa05   : > { %v4070_v61 = vpack.c.bf16 %v2498_v60, %v2497_v59  ;;  %v2519_v59 = vld [vmem:[%s4635_s30 + $0x220] sm:$0xff]  ;;  %v2520_v60 = vld [vmem:[%s4635_s30 + $0x228] sm:$0xff] }
 0xa07   : > { %4019 = vmatpush3.bf16.msra.mxu0 %v4018_v5  ;;  %4051 = vmatpush3.bf16.msra.mxu1 %v4050_v6  ;;  %v4104_v5 = vpack.c.bf16 %v2564_v4, %v2563_v2  ;;  %v1784_v6 = vlaneseq  ;;  %v2552_v4 = vld [vmem:[%s4635_s30 + $0x328] sm:$0xff] }
 0xa08   : > { %4021 = vmatprep.subr.bf16.mxu0 %v4020_v9  ;;  %4053 = vmatprep.subr.bf16.mxu1 %v4052_v10  ;;  %v4731_v9 = vld [vmem:[%s724_s20 + $0x8] sm:$0xff]  ;;  %s742_s20 = scalar_lea.vmem %s5047_s16, %s3507_s27 }
 0xa09   : > { %v4725_v7 = vshrl.u32 %v1784_v6, 7 }
 0xa0b   : > { %4023 = vmatpush3.bf16.msra.mxu0 %v4022_v19  ;;  %4055 = vmatpush3.bf16.msra.mxu1 %v4054_v16  ;;  %v1810_v8 = vsub.s32 6, %v4725_v7  ;;  %v1786_v11 = vsub.s32 0, %v4725_v7  ;;  %v1794_v13 = vsub.s32 2, %v4725_v7  ;;  %v1790_v15 = vsub.s32 1, %v4725_v7 }
 0xa0c   : > { %4025 = vmatprep.subr.bf16.mxu0 %v4024_v22  ;;  %4057 = vmatprep.subr.bf16.mxu1 %v4056_v23  ;;  %v1798_v17 = vsub.s32 3, %v4725_v7  ;;  %v2515_v23 = vld [vmem:[%s4635_s30 + $0x200] sm:$0xff] }
 0xa0d   : > { %v4736_v10 = vrot.slane %v4731_v9, %v1810_v8  ;;  %v1787_v18 = vrot.slane %v4740_v14, %v1786_v11  ;;  %v1795_v19 = vrot.slane %v4740_v14, %v1794_v13  ;;  %v1791_v16 = vrot.slane %v4740_v14, %v1790_v15 }
 0xa0e   : > { %v1799_v20 = vrot.slane %v4740_v14, %v1798_v17  ;;  %v4074_v41 = vpack.c.bf16 %v2516_v24, %v2515_v23  ;;  %v1819_v24 = vrot.slane %v4731_v9, %v1786_v11  ;;  %v2571_v11 = vld [vmem:[%s4635_s30 + $0x3c0] sm:$0xff] }
 0xa0f   : > { %4027 = vmatpush3.bf16.msra.mxu0 %v4026_v30  ;;  %4059 = vmatpush3.bf16.msra.mxu1 %v4058_v31  ;;  %v2548_v30 = vld [vmem:[%s4635_s30 + $0x308] sm:$0xff]  ;;  %v2533_v31 = vld [vmem:[%s4635_s30 + $0x290] sm:$0xff] }
 0xa10   : > { %4029 = vmatprep.subr.bf16.mxu0 %v4028_v34  ;;  %4061 = vmatprep.subr.bf16.mxu1 %v4060_v35  ;;  %v1806_v34 = vsub.s32 5, %v4725_v7  ;;  %v1814_v35 = vsub.s32 7, %v4725_v7  ;;  %v4076_v47 = vpack.c.bf16 %v2534_v1, %v2533_v31  ;;  %v2540_v1 = vld [vmem:[%s4635_s30 + $0x2c8] sm:$0xff] }
 0xa12   : > { %v1807_v12 = vrot.slane %v4740_v14, %v1806_v34  ;;  %v1815_v51 = vrot.slane %v4740_v14, %v1814_v35 }
 0xa13   : > { %4031 = vmatpush3.bf16.msra.mxu0 %v4030_v42  ;;  %4063 = vmatpush3.bf16.msra.mxu1 %v4062_v43  ;;  %v4106_v42 = vpack.c.bf16 %v2548_v30, %v2547_v29  ;;  %v2517_v43 = vld [vmem:[%s4635_s30 + $0x210] sm:$0xff]  ;;  %v1827_v29 = vrot.slane %v4731_v9, %v1794_v13 }
 0xa14   : > { %4033 = vmatprep.subr.bf16.mxu0 %v4032_v45  ;;  %4065 = vmatprep.subr.bf16.mxu1 %v4064_v46 }
 0xa17   : > { %4035 = vmatpush3.bf16.msra.mxu0 %v4034_v50  ;;  %4067 = vmatpush3.bf16.msra.mxu1 %v4066_v0  ;;  %v2550_v50 = vld [vmem:[%s4635_s30 + $0x318] sm:$0xff]  ;;  %v2535_v0 = vld [vmem:[%s4635_s30 + $0x2a0] sm:$0xff] }
 0xa18   : > { %4037 = vmatprep.subr.bf16.mxu0 %v4036_v53  ;;  %4069 = vmatprep.subr.bf16.mxu1 %v4068_v57  ;;  %v2567_v53 = vld [vmem:[%s4635_s30 + $0x3a0] sm:$0xff]  ;;  %v4078_v57 = vpack.c.bf16 %v2518_v44, %v2517_v43  ;;  %v4080_v63 = vpack.c.bf16 %v2536_v52, %v2535_v0  ;;  %v2524_v43 = vld [vmem:[%s4635_s30 + $0x248] sm:$0xff]  ;;  %v2541_v0 = vld [vmem:[%s4635_s30 + $0x2d0] sm:$0xff] }
 0xa19   : > { %v4112_v2 = vpack.c.bf16 %v2568_v54, %v2567_v53  ;;  %v2574_v52 = vld [vmem:[%s4635_s30 + $0x3d8] sm:$0xff]  ;;  %v1802_v53 = vsub.s32 4, %v4725_v7  ;;  %v2676_v7 = vld [vmem:[%s4635_s30 + $0x708] sm:$0xff] }
 0xa1b   : > { %4039 = vmatpush3.bf16.msra.mxu0 %v4038_v58  ;;  %4071 = vmatpush3.bf16.msra.mxu1 %v4070_v61  ;;  %v4110_v58 = vpack.c.bf16 %v2550_v50, %v2549_v49  ;;  %v2555_v49 = vld [vmem:[%s4635_s30 + $0x340] sm:$0xff]  ;;  %v2556_v50 = vld [vmem:[%s4635_s30 + $0x348] sm:$0xff] }
 0xa1c   : > { %4073 = vmatprep.subr.bf16.mxu0 %v4072_v3  ;;  %4105 = vmatprep.subr.bf16.mxu1 %v4104_v5  ;;  %v2551_v3 = vld [vmem:[%s4635_s30 + $0x320] sm:$0xff]  ;;  %v2537_v5 = vld [vmem:[%s4635_s30 + $0x2b0] sm:$0xff] }
 0xab9   : > { %v1933_v21 = vpop.f32.mrb[14].mxu0  ;;  %v2004_v22 = vpop.f32.mrb[8].mxu1 }
 0xaba   : > { %v1934_v25 = vadd.f32 %v1933_v21, %v1787_v18  ;;  %v2005_v26 = vadd.f32 %v2004_v22, %v1795_v19  ;;  %v1935_v27 = vpop.f32.mrb[15].mxu0  ;;  %v2006_v28 = vpop.f32.mrb[9].mxu1  ;;  %v2538_v19 = vld [vmem:[%s4635_s30 + $0x2b8] sm:$0xff]  ;;  %v4082_v21 = vpack.c.bf16 %v2520_v60, %v2519_v59  ;;  %v2557_v60 = vld [vmem:[%s4635_s30 + $0x350] sm:$0xff] }
 0xabb   : > { %v1936_v32 = vadd.f32 %v1935_v27, %v1791_v16  ;;  %v2007_v33 = vadd.f32 %v2006_v28, %v1799_v20  ;;  %v2569_v16 = vld [vmem:[%s4635_s30 + $0x3b0] sm:$0xff]  ;;  %v2570_v20 = vld [vmem:[%s4635_s30 + $0x3b8] sm:$0xff]  ;;  %v4084_v30 = vpack.c.bf16 %v2538_v19, %v2537_v5  ;;  %v2575_v5 = vld [vmem:[%s4635_s30 + $0x3e0] sm:$0xff] }
 0xabc   : > { %v2435_v45 = vmax.f32 %v1934_v25, 0.0  ;;  %v2437_v46 = vmax.f32 %v2005_v26, 0.0  ;;  %v4114_v25 = vpack.c.bf16 %v2552_v4, %v2551_v3  ;;  %v2521_v26 = vld [vmem:[%s4635_s30 + $0x230] sm:$0xff]  ;;  %v2522_v27 = vld [vmem:[%s4635_s30 + $0x238] sm:$0xff]  ;;  %v4116_v31 = vpack.c.bf16 %v2570_v20, %v2569_v16  ;;  %v2543_v3 = vld [vmem:[%s4635_s30 + $0x2e0] sm:$0xff] }
 0xabd   : > { %v2436_v39 = vmax.f32 %v1936_v32, 0.0  ;;  %v2438_v40 = vmax.f32 %v2007_v33, 0.0  ;;  %v2553_v28 = vld [vmem:[%s4635_s30 + $0x330] sm:$0xff]  ;;  %v2554_v32 = vld [vmem:[%s4635_s30 + $0x338] sm:$0xff]  ;;  %v2539_v33 = vld [vmem:[%s4635_s30 + $0x2c0] sm:$0xff]  ;;  %v4086_v13 = vpack.c.bf16 %v2522_v27, %v2521_v26 }
 0xabe   : > { %v2526_v59 = vld [vmem:[%s4635_s30 + $0x258] sm:$0xff]  ;;  %v2544_v4 = vld [vmem:[%s4635_s30 + $0x2e8] sm:$0xff] }
 0xabf   : > { %2778 = vmatprep.mubr.f32.mxu0 %v2436_v39  ;;  %2848 = vmatprep.mubr.f32.mxu1 %v2438_v40  ;;  %v4118_v40 = vpack.c.bf16 %v2554_v32, %v2553_v28  ;;  %v2546_v32 = vld [vmem:[%s4635_s30 + $0x2f8] sm:$0xff] }
 0xac0   : > { %2779 = vmatmul.mubr.f32.vlgmr.msra.gmra.mrb[22].mxu0 %v2435_v45  ;;  %2849 = vmatmul.mubr.f32.vlgmr.msra.gmra.mrb[16].mxu1 %v2437_v46 }
 0xac1   : > { %v4780_v55 = vpop.f32.mrb[16].mxu0  ;;  %v4782_v56 = vpop.f32.mrb[10].mxu1  ;;  %4075 = vmatpush3.bf16.msra.mxu0 %v4074_v41  ;;  %4107 = vmatpush3.bf16.msra.mxu1 %v4106_v42  ;;  %v4088_v41 = vpack.c.bf16 %v2540_v1, %v2539_v33  ;;  %v2523_v42 = vld [vmem:[%s4635_s30 + $0x240] sm:$0xff]  ;;  %v2577_v33 = vld [vmem:[%s4635_s30 + $0x3f0] sm:$0xff]  ;;  %v2578_v1 = vld [vmem:[%s4635_s30 + $0x3f8] sm:$0xff] }
 0xac2   : > { %v2077_v61 = vpop.f32.mrb[17].mxu0  ;;  %v2148_v62 = vpop.f32.mrb[11].mxu1  ;;  %4077 = vmatprep.subr.bf16.mxu0 %v4076_v47  ;;  %4109 = vmatprep.subr.bf16.mxu1 %v4108_v48  ;;  %v4120_v48 = vpack.c.bf16 %v2572_v36, %v2571_v11  ;;  %v4090_v54 = vpack.c.bf16 %v2524_v43, %v2523_v42  ;;  %v4132_v42 = vpack.c.bf16 %v2578_v1, %v2577_v33  ;;  %v2562_v43 = vld [vmem:[%s4635_s30 + $0x378] sm:$0xff]  ;;  %v2583_v33 = vld [vmem:[%s4635_s30 + $0x420] sm:$0xff]  ;;  %v2584_v1 = vld [vmem:[%s4635_s30 + $0x428] sm:$0xff] }
 0xac3   : > { %v2078_v6 = vadd.f32 %v2077_v61, %v1807_v12  ;;  %v2149_v18 = vadd.f32 %v2148_v62, %v1815_v51  ;;  %v2542_v12 = vld [vmem:[%s4635_s30 + $0x2d8] sm:$0xff]  ;;  %v2573_v51 = vld [vmem:[%s4635_s30 + $0x3d0] sm:$0xff]  ;;  %v1835_v61 = vrot.slane %v4731_v9, %v1802_v53 }
 0xac4   : > { %v4092_v62 = vpack.c.bf16 %v2542_v12, %v2541_v0  ;;  %v2627_v0 = vld [vmem:[%s4635_s30 + $0x580] sm:$0xff]  ;;  %v2628_v12 = vld [vmem:[%s4635_s30 + $0x588] sm:$0xff] }
 0xac5   : > { %v2440_v22 = vmax.f32 %v2078_v6, 0.0  ;;  %v2442_v23 = vmax.f32 %v2149_v18, 0.0  ;;  %4079 = vmatpush3.bf16.msra.mxu0 %v4078_v57  ;;  %4111 = vmatpush3.bf16.msra.mxu1 %v4110_v58  ;;  %v4122_v57 = vpack.c.bf16 %v2556_v50, %v2555_v49  ;;  %v2525_v58 = vld [vmem:[%s4635_s30 + $0x250] sm:$0xff]  ;;  %v2576_v6 = vld [vmem:[%s4635_s30 + $0x3e8] sm:$0xff]  ;;  %v1823_v50 = vrot.slane %v4731_v9, %v1790_v15 }
 0xac6   : > { %4081 = vmatprep.subr.bf16.mxu0 %v4080_v63  ;;  %4113 = vmatprep.subr.bf16.mxu1 %v4112_v2  ;;  %v4124_v63 = vpack.c.bf16 %v2574_v52, %v2573_v51  ;;  %v2558_v2 = vld [vmem:[%s4635_s30 + $0x358] sm:$0xff]  ;;  %v4094_v16 = vpack.c.bf16 %v2526_v59, %v2525_v58  ;;  %v4128_v28 = vpack.c.bf16 %v2576_v6, %v2575_v5  ;;  %v2596_v49 = vld [vmem:[%s4635_s30 + $0x488] sm:$0xff]  ;;  %v2611_v59 = vld [vmem:[%s4635_s30 + $0x500] sm:$0xff] }
 0xac7   : > { %2918 = vmatprep.mubr.f32.mxu0 %v2440_v22  ;;  %2988 = vmatprep.mubr.f32.mxu1 %v2442_v23  ;;  %v4126_v20 = vpack.c.bf16 %v2558_v2, %v2557_v60  ;;  %v2527_v22 = vld [vmem:[%s4635_s30 + $0x260] sm:$0xff]  ;;  %v2528_v23 = vld [vmem:[%s4635_s30 + $0x268] sm:$0xff]  ;;  %v2629_v2 = vld [vmem:[%s4635_s30 + $0x590] sm:$0xff] }
 0xac8   : > { %v4098_v11 = vpack.c.bf16 %v2528_v23, %v2527_v22  ;;  %v2580_v58 = vld [vmem:[%s4635_s30 + $0x408] sm:$0xff]  ;;  %v2581_v5 = vld [vmem:[%s4635_s30 + $0x410] sm:$0xff]  ;;  %v2582_v6 = vld [vmem:[%s4635_s30 + $0x418] sm:$0xff] }
 0xac9   : > { %v2217_v37 = vpop.f32.mrb[18].mxu0  ;;  %v2288_v39 = vpop.f32.mrb[12].mxu1  ;;  %4083 = vmatpush3.bf16.msra.mxu0 %v4082_v21  ;;  %4115 = vmatpush3.bf16.msra.mxu1 %v4114_v25  ;;  %v4096_v21 = vpack.c.bf16 %v2544_v4, %v2543_v3  ;;  %v2612_v60 = vld [vmem:[%s4635_s30 + $0x508] sm:$0xff] }
 0xaca   : > { %v4808_v44 = vadd.f32 %v2217_v37, %v1819_v24  ;;  %v4810_v45 = vadd.f32 %v2288_v39, %v1827_v29  ;;  %v4812_v46 = vpop.f32.mrb[19].mxu0  ;;  %v4814_v47 = vpop.f32.mrb[13].mxu1  ;;  %4085 = vmatprep.subr.bf16.mxu0 %v4084_v30  ;;  %4117 = vmatprep.subr.bf16.mxu1 %v4116_v31  ;;  %v2559_v29 = vld [vmem:[%s4635_s30 + $0x360] sm:$0xff]  ;;  %v2560_v30 = vld [vmem:[%s4635_s30 + $0x368] sm:$0xff]  ;;  %v2545_v31 = vld [vmem:[%s4635_s30 + $0x2f0] sm:$0xff] }
 0xacb   : > { %v4130_v36 = vpack.c.bf16 %v2560_v30, %v2559_v29  ;;  %v2529_v37 = vld [vmem:[%s4635_s30 + $0x270] sm:$0xff]  ;;  %v2530_v39 = vld [vmem:[%s4635_s30 + $0x278] sm:$0xff]  ;;  %v2600_v22 = vld [vmem:[%s4635_s30 + $0x4a8] sm:$0xff]  ;;  %v4142_v30 = vpack.c.bf16 %v2582_v6, %v2581_v5 }
 0xacc   : > { %v2632_v29 = vld [vmem:[%s4635_s30 + $0x5a8] sm:$0xff]  ;;  %v2621_v5 = vld [vmem:[%s4635_s30 + $0x550] sm:$0xff] }
 0xacd   : > { %4087 = vmatpush3.bf16.msra.mxu0 %v4086_v13  ;;  %4119 = vmatpush3.bf16.msra.mxu1 %v4118_v40  ;;  %v2561_v13 = vld [vmem:[%s4635_s30 + $0x370] sm:$0xff]  ;;  %v1811_v40 = vrot.slane %v4740_v14, %v1810_v8  ;;  %v1831_v8 = vrot.slane %v4731_v9, %v1798_v17  ;;  %v2220_v17 = vadd.f32 %v4812_v46, %v1823_v50 }
 0xace   : > { %4089 = vmatprep.subr.bf16.mxu0 %v4088_v41  ;;  %4121 = vmatprep.subr.bf16.mxu1 %v4120_v48  ;;  %v4100_v41 = vpack.c.bf16 %v2546_v32, %v2545_v31  ;;  %v2595_v48 = vld [vmem:[%s4635_s30 + $0x480] sm:$0xff]  ;;  %v4134_v51 = vpack.c.bf16 %v2562_v43, %v2561_v13  ;;  %v4170_v46 = vpack.c.bf16 %v2612_v60, %v2611_v59  ;;  %v2633_v13 = vld [vmem:[%s4635_s30 + $0x5b0] sm:$0xff]  ;;  %v2620_v60 = vld [vmem:[%s4635_s30 + $0x548] sm:$0xff] }
 0xacf   : > { %v4136_v52 = vpack.c.bf16 %v2596_v49, %v2595_v48  ;;  %v2147_v15 = vadd.f32 %v4782_v56, %v1811_v40  ;;  %v2634_v40 = vld [vmem:[%s4635_s30 + $0x5b8] sm:$0xff]  ;;  %v2585_v48 = vld [vmem:[%s4635_s30 + $0x430] sm:$0xff] }
 0xad0   : > { %v2586_v49 = vld [vmem:[%s4635_s30 + $0x438] sm:$0xff]  ;;  %v2617_v50 = vld [vmem:[%s4635_s30 + $0x530] sm:$0xff] }
 0xad1   : > { %v2359_v18 = vpop.f32.mrb[20].mxu0  ;;  %v2430_v19 = vpop.f32.mrb[14].mxu1  ;;  %4091 = vmatpush3.bf16.msra.mxu0 %v4090_v54  ;;  %4123 = vmatpush3.bf16.msra.mxu1 %v4122_v57  ;;  %v4168_v54 = vpack.c.bf16 %v2628_v12, %v2627_v0  ;;  %v2579_v57 = vld [vmem:[%s4635_s30 + $0x400] sm:$0xff]  ;;  %v2441_v4 = vmax.f32 %v2147_v15, 0.0  ;;  %v4180_v0 = vpack.c.bf16 %v2634_v40, %v2633_v13  ;;  %v2618_v12 = vld [vmem:[%s4635_s30 + $0x538] sm:$0xff]  ;;  %v2593_v13 = vld [vmem:[%s4635_s30 + $0x470] sm:$0xff] }
 0xad2   : > { %v4834_v24 = vadd.f32 %v2359_v18, %v1835_v61  ;;  %v4837_v25 = vadd.f32 %v2430_v19, %v4736_v10  ;;  %v4839_v26 = vpop.f32.mrb[21].mxu0  ;;  %v4841_v27 = vpop.f32.mrb[15].mxu1  ;;  %4093 = vmatprep.subr.bf16.mxu0 %v4092_v62  ;;  %4125 = vmatprep.subr.bf16.mxu1 %v4124_v63  ;;  %v1803_v10 = vrot.slane %v4740_v14, %v1802_v53  ;;  %v2597_v61 = vld [vmem:[%s4635_s30 + $0x490] sm:$0xff]  ;;  %v2598_v63 = vld [vmem:[%s4635_s30 + $0x498] sm:$0xff] }
 0xad3   : > { %v4102_v14 = vpack.c.bf16 %v2530_v39, %v2529_v37  ;;  %v2291_v62 = vadd.f32 %v4814_v47, %v1831_v8  ;;  %v4138_v56 = vpack.c.bf16 %v2580_v58, %v2579_v57  ;;  %v2613_v18 = vld [vmem:[%s4635_s30 + $0x510] sm:$0xff]  ;;  %v2444_v47 = vmax.f32 %v2220_v17, 0.0  ;;  %v2602_v39 = vld [vmem:[%s4635_s30 + $0x4b8] sm:$0xff]  ;;  %v2603_v8 = vld [vmem:[%s4635_s30 + $0x4c0] sm:$0xff] }
 0xad4   : > { %v2076_v53 = vadd.f32 %v4780_v55, %v1803_v10  ;;  %v2630_v55 = vld [vmem:[%s4635_s30 + $0x598] sm:$0xff]  ;;  %v4140_v19 = vpack.c.bf16 %v2598_v63, %v2597_v61  ;;  %v2615_v10 = vld [vmem:[%s4635_s30 + $0x520] sm:$0xff]  ;;  %v2601_v37 = vld [vmem:[%s4635_s30 + $0x4b0] sm:$0xff]  ;;  %v4182_v15 = vpack.c.bf16 %v2618_v12, %v2617_v50  ;;  %v1839_v50 = vrot.slane %v4731_v9, %v1806_v34 }
 0xad5   : > { %4095 = vmatpush3.bf16.msra.mxu0 %v4094_v16  ;;  %4127 = vmatpush3.bf16.msra.mxu1 %v4126_v20  ;;  %v4172_v16 = vpack.c.bf16 %v2630_v55, %v2629_v2  ;;  %v2614_v20 = vld [vmem:[%s4635_s30 + $0x518] sm:$0xff]  ;;  %v2446_v23 = vmax.f32 %v2291_v62, 0.0  ;;  %v4148_v43 = vpack.c.bf16 %v2602_v39, %v2601_v37  ;;  %v2587_v57 = vld [vmem:[%s4635_s30 + $0x440] sm:$0xff]  ;;  %v2588_v58 = vld [vmem:[%s4635_s30 + $0x448] sm:$0xff] }
 0xad6   : > { %4097 = vmatprep.subr.bf16.mxu0 %v4096_v21  ;;  %4129 = vmatprep.subr.bf16.mxu1 %v4128_v28  ;;  %v2439_v3 = vmax.f32 %v2076_v53, 0.0  ;;  %v2599_v21 = vld [vmem:[%s4635_s30 + $0x4a0] sm:$0xff]  ;;  %v4174_v31 = vpack.c.bf16 %v2614_v20, %v2613_v18  ;;  %v4150_v53 = vpack.c.bf16 %v2586_v49, %v2585_v48  ;;  %v2605_v61 = vld [vmem:[%s4635_s30 + $0x4d0] sm:$0xff]  ;;  %v2606_v62 = vld [vmem:[%s4635_s30 + $0x4d8] sm:$0xff]  ;;  %v4154_v55 = vpack.c.bf16 %v2588_v58, %v2587_v57 }
 0xad7   : > { %v2631_v28 = vld [vmem:[%s4635_s30 + $0x5a0] sm:$0xff]  ;;  %v4144_v32 = vpack.c.bf16 %v2600_v22, %v2599_v21  ;;  %v2637_v63 = vld [vmem:[%s4635_s30 + $0x5d0] sm:$0xff]  ;;  %v2638_v2 = vld [vmem:[%s4635_s30 + $0x5d8] sm:$0xff]  ;;  %v2362_v57 = vadd.f32 %v4839_v26, %v1839_v50 }
 0xad8   : > { %v2619_v17 = vld [vmem:[%s4635_s30 + $0x540] sm:$0xff]  ;;  %v4188_v6 = vpack.c.bf16 %v2638_v2, %v2637_v63  ;;  %v2622_v18 = vld [vmem:[%s4635_s30 + $0x558] sm:$0xff]  ;;  %v2640_v20 = vld [vmem:[%s4635_s30 + $0x5e8] sm:$0xff] }
 0xad9   : > { %4099 = vmatpush3.bf16.msra.mxu0 %v4098_v11  ;;  %4131 = vmatpush3.bf16.msra.mxu1 %v4130_v36  ;;  %v4176_v11 = vpack.c.bf16 %v2632_v29, %v2631_v28  ;;  %v2616_v36 = vld [vmem:[%s4635_s30 + $0x528] sm:$0xff]  ;;  %v4190_v22 = vpack.c.bf16 %v2622_v18, %v2621_v5  ;;  %v2591_v28 = vld [vmem:[%s4635_s30 + $0x460] sm:$0xff]  ;;  %v2594_v40 = vld [vmem:[%s4635_s30 + $0x478] sm:$0xff] }
 0xada   : > { %4101 = vmatprep.subr.bf16.mxu0 %v4100_v41  ;;  %4133 = vmatprep.subr.bf16.mxu1 %v4132_v42  ;;  %v4146_v41 = vpack.c.bf16 %v2584_v1, %v2583_v33  ;;  %v4178_v42 = vpack.c.bf16 %v2616_v36, %v2615_v10  ;;  %v2592_v29 = vld [vmem:[%s4635_s30 + $0x468] sm:$0xff]  ;;  %v2609_v33 = vld [vmem:[%s4635_s30 + $0x4f0] sm:$0xff]  ;;  %v2610_v1 = vld [vmem:[%s4635_s30 + $0x4f8] sm:$0xff] }
 0xadb   : > { %v2641_v10 = vld [vmem:[%s4635_s30 + $0x5f0] sm:$0xff]  ;;  %v4162_v36 = vpack.c.bf16 %v2592_v29, %v2591_v28  ;;  %v4164_v39 = vpack.c.bf16 %v2610_v1, %v2609_v33  ;;  %v2659_v48 = vld [vmem:[%s4635_s30 + $0x680] sm:$0xff]  ;;  %v2660_v49 = vld [vmem:[%s4635_s30 + $0x688] sm:$0xff] }
 0xadc   : > { %v2692_v12 = vld [vmem:[%s4635_s30 + $0x788] sm:$0xff]  ;;  %v2645_v63 = vld [vmem:[%s4635_s30 + $0x610] sm:$0xff]  ;;  %v2646_v26 = vld [vmem:[%s4635_s30 + $0x618] sm:$0xff] }
 0xadd   : > { %4103 = vmatpush3.bf16.msra.mxu0 %v4102_v14  ;;  %4135 = vmatpush3.bf16.msra.mxu1 %v4134_v51  ;;  %v2604_v14 = vld [vmem:[%s4635_s30 + $0x4c8] sm:$0xff]  ;;  %v2635_v51 = vld [vmem:[%s4635_s30 + $0x5c0] sm:$0xff]  ;;  %v2677_v2 = vld [vmem:[%s4635_s30 + $0x710] sm:$0xff] }
 0xade   : > { %4137 = vmatprep.subr.bf16.mxu0 %v4136_v52  ;;  %4169 = vmatprep.subr.bf16.mxu1 %v4168_v54  ;;  %v2636_v52 = vld [vmem:[%s4635_s30 + $0x5c8] sm:$0xff]  ;;  %v4152_v54 = vpack.c.bf16 %v2604_v14, %v2603_v8  ;;  %v1847_v8 = vrot.slane %v4731_v9, %v1814_v35  ;;  %v4166_v14 = vpack.c.bf16 %v2594_v40, %v2593_v13  ;;  %v2661_v9 = vld [vmem:[%s4635_s30 + $0x690] sm:$0xff]  ;;  %v2662_v35 = vld [vmem:[%s4635_s30 + $0x698] sm:$0xff] }
 0xadf   : > { %v4184_v59 = vpack.c.bf16 %v2636_v52, %v2635_v51  ;;  %v4200_v52 = vpack.c.bf16 %v2660_v49, %v2659_v48  ;;  %v2695_v5 = vld [vmem:[%s4635_s30 + $0x7a0] sm:$0xff]  ;;  %v2665_v28 = vld [vmem:[%s4635_s30 + $0x6b0] sm:$0xff]  ;;  %v2666_v29 = vld [vmem:[%s4635_s30 + $0x6b8] sm:$0xff] }
 0xae0   : > { %2919 = vmatmul.mubr.f32.vlgmr.msra.gmra.mrb[24].mxu0 %v2439_v3  ;;  %2989 = vmatmul.mubr.f32.vlgmr.msra.gmra.mrb[18].mxu1 %v2441_v4  ;;  %v4156_v3 = vpack.c.bf16 %v2606_v62, %v2605_v61  ;;  %v2589_v4 = vld [vmem:[%s4635_s30 + $0x450] sm:$0xff]  ;;  %v2433_v58 = vadd.f32 %v4841_v27, %v1847_v8  ;;  %v2443_v61 = vmax.f32 %v4808_v44, 0.0  ;;  %v4204_v27 = vpack.c.bf16 %v2662_v35, %v2661_v9  ;;  %v2667_v13 = vld [vmem:[%s4635_s30 + $0x6c0] sm:$0xff]  ;;  %v2668_v40 = vld [vmem:[%s4635_s30 + $0x6c8] sm:$0xff] }
 0xae1   : > { %4139 = vmatpush3.bf16.msra.mxu0 %v4138_v56  ;;  %3058 = vmatprep.mubr.f32.mxu0 %v2444_v47  ;;  %v4186_v56 = vpack.c.bf16 %v2620_v60, %v2619_v17  ;;  %v2607_v47 = vld [vmem:[%s4635_s30 + $0x4e0] sm:$0xff]  ;;  %v2694_v60 = vld [vmem:[%s4635_s30 + $0x798] sm:$0xff]  ;;  %v4212_v1 = vpack.c.bf16 %v2666_v29, %v2665_v28  ;;  %v4216_v49 = vpack.c.bf16 %v2668_v40, %v2667_v13  ;;  %v2685_v35 = vld [vmem:[%s4635_s30 + $0x750] sm:$0xff]  ;;  %v2447_v29 = vmax.f32 %v4834_v24, 0.0 }
 0xae2   : > { %4171 = vmatpush3.bf16.msra.mxu1 %v4170_v46  ;;  %3128 = vmatprep.mubr.f32.mxu1 %v2446_v23  ;;  %v2590_v46 = vld [vmem:[%s4635_s30 + $0x458] sm:$0xff]  ;;  %v2450_v18 = vmax.f32 %v2433_v58, 0.0  ;;  %v2651_v50 = vld [vmem:[%s4635_s30 + $0x640] sm:$0xff] }
 0xae3   : > { %4141 = vmatprep.subr.bf16.mxu0 %v4140_v19  ;;  %4173 = vmatprep.subr.bf16.mxu1 %v4172_v16  ;;  %v2608_v19 = vld [vmem:[%s4635_s30 + $0x4e8] sm:$0xff]  ;;  %v2639_v16 = vld [vmem:[%s4635_s30 + $0x5e0] sm:$0xff]  ;;  %v4158_v21 = vpack.c.bf16 %v2590_v46, %v2589_v4  ;;  %v2448_v46 = vmax.f32 %v2362_v57, 0.0  ;;  %v2653_v57 = vld [vmem:[%s4635_s30 + $0x650] sm:$0xff] }
 0xae4   : > { %v4160_v23 = vpack.c.bf16 %v2608_v19, %v2607_v47  ;;  %v2664_v4 = vld [vmem:[%s4635_s30 + $0x6a8] sm:$0xff]  ;;  %v2654_v9 = vld [vmem:[%s4635_s30 + $0x658] sm:$0xff] }
 0xae5   : > { %4143 = vmatpush3.bf16.msra.mxu0 %v4142_v30  ;;  %v2623_v30 = vld [vmem:[%s4635_s30 + $0x560] sm:$0xff] }
 0xae6   : > { %4175 = vmatpush3.bf16.msra.mxu1 %v4174_v31  ;;  %4145 = vmatprep.subr.bf16.mxu0 %v4144_v32  ;;  %v4192_v31 = vpack.c.bf16 %v2640_v20, %v2639_v16  ;;  %v2624_v32 = vld [vmem:[%s4635_s30 + $0x568] sm:$0xff]  ;;  %v2647_v16 = vld [vmem:[%s4635_s30 + $0x620] sm:$0xff] }
 0xae7   : > { %4177 = vmatprep.subr.bf16.mxu1 %v4176_v11  ;;  %v2642_v11 = vld [vmem:[%s4635_s30 + $0x5f8] sm:$0xff]  ;;  %v4194_v37 = vpack.c.bf16 %v2624_v32, %v2623_v30  ;;  %v2648_v20 = vld [vmem:[%s4635_s30 + $0x628] sm:$0xff]  ;;  %v2697_v30 = vld [vmem:[%s4635_s30 + $0x7b0] sm:$0xff] }
 0xae8   : > { %v4210_v32 = vpack.c.bf16 %v2648_v20, %v2647_v16  ;;  %v2658_v16 = vld [vmem:[%s4635_s30 + $0x678] sm:$0xff] }
 0xae9   : > { %4147 = vmatpush3.bf16.msra.mxu0 %v4146_v41  ;;  %v2625_v41 = vld [vmem:[%s4635_s30 + $0x570] sm:$0xff] }
 0xaea   : > { %4179 = vmatpush3.bf16.msra.mxu1 %v4178_v42  ;;  %4149 = vmatprep.subr.bf16.mxu0 %v4148_v43  ;;  %v4196_v42 = vpack.c.bf16 %v2642_v11, %v2641_v10  ;;  %v2626_v43 = vld [vmem:[%s4635_s30 + $0x578] sm:$0xff]  ;;  %v2649_v10 = vld [vmem:[%s4635_s30 + $0x630] sm:$0xff] }
 0xaeb   : > { %4181 = vmatprep.subr.bf16.mxu1 %v4180_v0  ;;  %v2691_v0 = vld [vmem:[%s4635_s30 + $0x780] sm:$0xff]  ;;  %v4198_v51 = vpack.c.bf16 %v2626_v43, %v2625_v41  ;;  %v2650_v11 = vld [vmem:[%s4635_s30 + $0x638] sm:$0xff] }
 0xaec   : > { %v4232_v34 = vpack.c.bf16 %v2692_v12, %v2691_v0  ;;  %v2699_v41 = vld [vmem:[%s4635_s30 + $0x7c0] sm:$0xff]  ;;  %v4214_v43 = vpack.c.bf16 %v2650_v11, %v2649_v10  ;;  %v2652_v0 = vld [vmem:[%s4635_s30 + $0x648] sm:$0xff] }
 0xaed   : > { %4151 = vmatpush3.bf16.msra.mxu0 %v4150_v53  ;;  %v2643_v53 = vld [vmem:[%s4635_s30 + $0x600] sm:$0xff] }
 0xaee   : > { %4183 = vmatpush3.bf16.msra.mxu1 %v4182_v15  ;;  %4153 = vmatprep.subr.bf16.mxu0 %v4152_v54  ;;  %v2644_v15 = vld [vmem:[%s4635_s30 + $0x608] sm:$0xff]  ;;  %v2675_v54 = vld [vmem:[%s4635_s30 + $0x700] sm:$0xff] }
 0xaef   : > { %4185 = vmatprep.subr.bf16.mxu1 %v4184_v59  ;;  %v4202_v17 = vpack.c.bf16 %v2644_v15, %v2643_v53  ;;  %v2693_v59 = vld [vmem:[%s4635_s30 + $0x790] sm:$0xff]  ;;  %v4234_v62 = vpack.c.bf16 %v2676_v7, %v2675_v54  ;;  %v2683_v12 = vld [vmem:[%s4635_s30 + $0x740] sm:$0xff]  ;;  %v2702_v15 = vld [vmem:[%s4635_s30 + $0x7d8] sm:$0xff] }
 0xaf0   : > { %v4236_v44 = vpack.c.bf16 %v2694_v60, %v2693_v59  ;;  %v2701_v53 = vld [vmem:[%s4635_s30 + $0x7d0] sm:$0xff]  ;;  %v2671_v59 = vld [vmem:[%s4635_s30 + $0x6e0] sm:$0xff]  ;;  %v2672_v60 = vld [vmem:[%s4635_s30 + $0x6e8] sm:$0xff] }
 0xaf1   : > { %4155 = vmatpush3.bf16.msra.mxu0 %v4154_v55  ;;  %v2445_v55 = vmax.f32 %v4810_v45, 0.0  ;;  %v4206_v45 = vpack.c.bf16 %v2646_v26, %v2645_v63  ;;  %v4252_v58 = vpack.c.bf16 %v2702_v15, %v2701_v53  ;;  %v4222_v63 = vpack.c.bf16 %v2654_v9, %v2653_v57 }
 0xaf2   : > { %4187 = vmatpush3.bf16.msra.mxu1 %v4186_v56  ;;  %4157 = vmatprep.subr.bf16.mxu0 %v4156_v3  ;;  %v2678_v56 = vld [vmem:[%s4635_s30 + $0x718] sm:$0xff]  ;;  %v2663_v3 = vld [vmem:[%s4635_s30 + $0x6a0] sm:$0xff] }
 0xaf3   : > { %4189 = vmatprep.subr.bf16.mxu1 %v4188_v6  ;;  %v2696_v6 = vld [vmem:[%s4635_s30 + $0x7a8] sm:$0xff]  ;;  %v4238_v47 = vpack.c.bf16 %v2678_v56, %v2677_v2  ;;  %v4208_v19 = vpack.c.bf16 %v2664_v4, %v2663_v3  ;;  %v4224_v2 = vpack.c.bf16 %v2672_v60, %v2671_v59  ;;  %v2687_v56 = vld [vmem:[%s4635_s30 + $0x760] sm:$0xff] }
 0xaf4   : > { %v2688_v4 = vld [vmem:[%s4635_s30 + $0x768] sm:$0xff] }
 0xaf5   : > { %4159 = vmatpush3.bf16.msra.mxu0 %v4158_v21  ;;  %v2679_v21 = vld [vmem:[%s4635_s30 + $0x720] sm:$0xff] }
 0xaf6   : > { %4191 = vmatpush3.bf16.msra.mxu1 %v4190_v22  ;;  %4161 = vmatprep.subr.bf16.mxu0 %v4160_v23  ;;  %v4240_v22 = vpack.c.bf16 %v2696_v6, %v2695_v5  ;;  %v2680_v23 = vld [vmem:[%s4635_s30 + $0x728] sm:$0xff]  ;;  %v2705_v5 = vld [vmem:[%s4635_s30 + $0x7f0] sm:$0xff]  ;;  %v2706_v6 = vld [vmem:[%s4635_s30 + $0x7f8] sm:$0xff] }
 0xaf7   : > { %4193 = vmatprep.subr.bf16.mxu1 %v4192_v31  ;;  %v2698_v31 = vld [vmem:[%s4635_s30 + $0x7b8] sm:$0xff]  ;;  %v4242_v33 = vpack.c.bf16 %v2680_v23, %v2679_v21  ;;  %v4260_v20 = vpack.c.bf16 %v2706_v6, %v2705_v5  ;;  %v2689_v21 = vld [vmem:[%s4635_s30 + $0x770] sm:$0xff] }
 0xaf9   : > { %4163 = vmatpush3.bf16.msra.mxu0 %v4162_v36  ;;  %v2681_v36 = vld [vmem:[%s4635_s30 + $0x730] sm:$0xff] }
 0xafa   : > { %4195 = vmatpush3.bf16.msra.mxu1 %v4194_v37  ;;  %4165 = vmatprep.subr.bf16.mxu0 %v4164_v39  ;;  %v4244_v37 = vpack.c.bf16 %v2698_v31, %v2697_v30  ;;  %v2682_v39 = vld [vmem:[%s4635_s30 + $0x738] sm:$0xff]  ;;  %v2449_v30 = vmax.f32 %v4837_v25, 0.0 }
 0xafb   : > { %4197 = vmatprep.subr.bf16.mxu1 %v4196_v42  ;;  %v2700_v42 = vld [vmem:[%s4635_s30 + $0x7c8] sm:$0xff]  ;;  %v4246_v48 = vpack.c.bf16 %v2682_v39, %v2681_v36 }
 0xafc   : > { %v4248_v8 = vpack.c.bf16 %v2700_v42, %v2699_v41 }
 0xafd   : > { %4167 = vmatpush3.bf16.msra.mxu0 %v4166_v14  ;;  %v2684_v14 = vld [vmem:[%s4635_s30 + $0x748] sm:$0xff] }
 0xafe   : > { %4199 = vmatpush3.bf16.msra.mxu1 %v4198_v51  ;;  %4201 = vmatprep.subr.bf16.mxu0 %v4200_v52  ;;  %v2669_v51 = vld [vmem:[%s4635_s30 + $0x6d0] sm:$0xff]  ;;  %v2670_v52 = vld [vmem:[%s4635_s30 + $0x6d8] sm:$0xff]  ;;  %v4250_v54 = vpack.c.bf16 %v2684_v14, %v2683_v12 }
 0xaff   : > { %4233 = vmatprep.subr.bf16.mxu1 %v4232_v34  ;;  %v4218_v34 = vpack.c.bf16 %v2652_v0, %v2651_v50  ;;  %v4220_v7 = vpack.c.bf16 %v2670_v52, %v2669_v51 }
 0xb00   : > { %3059 = vmatmul.mubr.f32.vlgmr.msra.gmra.mrb[26].mxu0 %v2443_v61  ;;  %v2703_v61 = vld [vmem:[%s4635_s30 + $0x7e0] sm:$0xff] }
 0xb01   : > { %3129 = vmatmul.mubr.f32.vlgmr.msra.gmra.mrb[20].mxu1 %v2445_v55  ;;  %4203 = vmatpush3.bf16.msra.mxu0 %v4202_v17  ;;  %v2686_v17 = vld [vmem:[%s4635_s30 + $0x758] sm:$0xff]  ;;  %v2655_v55 = vld [vmem:[%s4635_s30 + $0x660] sm:$0xff] }
 0xb02   : > { %3198 = vmatprep.mubr.f32.mxu0 %v2448_v46  ;;  %4235 = vmatpush3.bf16.msra.mxu1 %v4234_v62  ;;  %v2704_v62 = vld [vmem:[%s4635_s30 + $0x7e8] sm:$0xff]  ;;  %v4254_v26 = vpack.c.bf16 %v2686_v17, %v2685_v35  ;;  %v2673_v46 = vld [vmem:[%s4635_s30 + $0x6f0] sm:$0xff] }
 0xb03   : > { %3268 = vmatprep.mubr.f32.mxu1 %v2450_v18  ;;  %4205 = vmatprep.subr.bf16.mxu0 %v4204_v27  ;;  %v2656_v27 = vld [vmem:[%s4635_s30 + $0x668] sm:$0xff]  ;;  %v4256_v3 = vpack.c.bf16 %v2704_v62, %v2703_v61 }
 0xb04   : > { %4237 = vmatprep.subr.bf16.mxu1 %v4236_v44  ;;  %v2674_v44 = vld [vmem:[%s4635_s30 + $0x6f8] sm:$0xff]  ;;  %v4226_v18 = vpack.c.bf16 %v2656_v27, %v2655_v55  ;;  %v3549_v27 = vld [vmem:[%s735_s28] ss:$0 sm:$0xff] }
 0xb05   : > { %4207 = vmatpush3.bf16.msra.mxu0 %v4206_v45  ;;  %v4258_v45 = vpack.c.bf16 %v2688_v4, %v2687_v56 }
 0xb06   : > { %4239 = vmatpush3.bf16.msra.mxu1 %v4238_v47  ;;  %4209 = vmatprep.subr.bf16.mxu0 %v4208_v19  ;;  %v4228_v47 = vpack.c.bf16 %v2674_v44, %v2673_v46  ;;  %v2657_v19 = vld [vmem:[%s4635_s30 + $0x670] sm:$0xff] }
 0xb07   : > { %4241 = vmatprep.subr.bf16.mxu1 %v4240_v22  ;;  %v2690_v22 = vld [vmem:[%s4635_s30 + $0x778] sm:$0xff]  ;;  %v4230_v23 = vpack.c.bf16 %v2658_v16, %v2657_v19 }
 0xb08   : > { %v4262_v28 = vpack.c.bf16 %v2690_v22, %v2689_v21 }
 0xb09   : > { %4211 = vmatpush3.bf16.msra.mxu0 %v4210_v32 }
 0xb0a   : > { %4243 = vmatpush3.bf16.msra.mxu1 %v4242_v33  ;;  %4213 = vmatprep.subr.bf16.mxu0 %v4212_v1  ;;  %v3548_v33 = vld [vmem:[%s732_s17] ss:$0 sm:$0xff] }
 0xb0b   : > { %4245 = vmatprep.subr.bf16.mxu1 %v4244_v37 }
 0xb0d   : > { %4215 = vmatpush3.bf16.msra.mxu0 %v4214_v43 }
 0xb0e   : > { %4247 = vmatpush3.bf16.msra.mxu1 %v4246_v48  ;;  %4217 = vmatprep.subr.bf16.mxu0 %v4216_v49 }
 0xb0f   : > { %4249 = vmatprep.subr.bf16.mxu1 %v4248_v8 }
 0xb11   : > { %4219 = vmatpush3.bf16.msra.mxu0 %v4218_v34 }
 0xb12   : > { %4251 = vmatpush3.bf16.msra.mxu1 %v4250_v54  ;;  %4221 = vmatprep.subr.bf16.mxu0 %v4220_v7 }
 0xb13   : > { %4253 = vmatprep.subr.bf16.mxu1 %v4252_v58 }
 0xb15   : > { %4223 = vmatpush3.bf16.msra.mxu0 %v4222_v63 }
 0xb16   : > { %4255 = vmatpush3.bf16.msra.mxu1 %v4254_v26  ;;  %4225 = vmatprep.subr.bf16.mxu0 %v4224_v2 }
 0xb17   : > { %4257 = vmatprep.subr.bf16.mxu1 %v4256_v3  ;;  %v3550_v3 = vld [vmem:[%s738_s0] ss:$0 sm:$0xff] }
 0xb19   : > { %4227 = vmatpush3.bf16.msra.mxu0 %v4226_v18 }
 0xb1a   : > { %4259 = vmatpush3.bf16.msra.mxu1 %v4258_v45  ;;  %4229 = vmatprep.subr.bf16.mxu0 %v4228_v47 }
 0xb1b   : > { %4261 = vmatprep.subr.bf16.mxu1 %v4260_v20 }
 0xb1d   : > { %4231 = vmatpush3.bf16.msra.mxu0 %v4230_v23 }
 0xb1e   : > { %4263 = vmatpush3.bf16.msra.mxu1 %v4262_v28 }
 0xb20   : > { %3199 = vmatmul.mubr.f32.vlgmr.msra.gmra.mrb[28].mxu0 %v2447_v29 }
 0xb21   : > { %3269 = vmatmul.mubr.f32.vlgmr.msra.gmra.mrb[22].mxu1 %v2449_v30 }
 0xb93   : > { %v3617_v31 = vpop.f32.mrb[22].mxu0  ;;  %v3652_v32 = vpop.f32.mrb[16].mxu1 }
 0xb94   : > { %v3618_v1 = vpop.f32.mrb[23].mxu0  ;;  %v3653_v10 = vpop.f32.mrb[17].mxu1 }
 0xb95   : > { %v3619_v11 = vadd.f32 %v3618_v1, %v3617_v31  ;;  %v3654_v36 = vadd.f32 %v3653_v10, %v3652_v32 }
 0xb97   : > { %v2781_v37 = vadd.f32 %v3619_v11, %v3548_v33 }
 0xb99   : > { %v2851_v39 = vadd.f32 %v3654_v36, %v2781_v37 }
 0xbb3   : > { %v3687_v13 = vpop.f32.mrb[24].mxu0  ;;  %v3722_v24 = vpop.f32.mrb[18].mxu1 }
 0xbb4   : > { %v3688_v40 = vpop.f32.mrb[25].mxu0  ;;  %v3723_v41 = vpop.f32.mrb[19].mxu1 }
 0xbb5   : > { %v3689_v25 = vadd.f32 %v3688_v40, %v3687_v13  ;;  %v3724_v42 = vadd.f32 %v3723_v41, %v3722_v24 }
 0xbb7   : > { %v2921_v43 = vadd.f32 %v3689_v25, %v2851_v39 }
 0xbb9   : > { %v2991_v48 = vadd.f32 %v3724_v42, %v2921_v43 }
 0xbd3   : > { %v3757_v49 = vpop.f32.mrb[26].mxu0 }
 0xbd4   : > { %v3792_v50 = vpop.f32.mrb[20].mxu1  ;;  %v3758_v0 = vpop.f32.mrb[27].mxu0 }
 0xbd5   : > { %v3759_v12 = vadd.f32 %v3758_v0, %v3757_v49  ;;  %v3793_v8 = vpop.f32.mrb[21].mxu1 }
 0xbd6   : > { %v3794_v14 = vadd.f32 %v3793_v8, %v3792_v50 }
 0xbd7   : > { %v3061_v51 = vadd.f32 %v3759_v12, %v2991_v48 }
 0xbd9   : > { %v3131_v52 = vadd.f32 %v3794_v14, %v3061_v51 }
 0xbf3   : > { %v3827_v53 = vpop.f32.mrb[28].mxu0 }
 0xbf4   : > { %v3862_v15 = vpop.f32.mrb[22].mxu1  ;;  %v3828_v34 = vpop.f32.mrb[29].mxu0 }
 0xbf5   : > { %v3829_v54 = vadd.f32 %v3828_v34, %v3827_v53  ;;  %v3863_v7 = vpop.f32.mrb[23].mxu1 }
 0xbf6   : > { %v3864_v57 = vadd.f32 %v3863_v7, %v3862_v15 }
 0xbf7   : > { %v3201_v9 = vadd.f32 %v3829_v54, %v3131_v52 }
 0xbf9   : > { %v3271_v35 = vadd.f32 %v3864_v57, %v3201_v9 }
 0xbfb   : > { %v3274_v58 = vadd.f32 %v3271_v35, %v4592_v38 }
 0xbfd   : > { %v3275_v17 = vsel %vm842_vm3, %v3274_v58, 0.0 }
 0xbfe   : > { %3276 = vadd.xlane.f32.xlu0 %v3275_v17 }
 0xc8b   : > { %v3277_v59 = vpop.xlane.xlu0 %3276 }
 0xc8c   : > { %v3278_v60 = vmul.f32 0.03125, %v3277_v59 }
 0xc8e   : > { %v3279_v61 = vsub.f32 %v3274_v58, %v3278_v60 }
 0xc90   : > { %v3280_v62 = vmul.f32 %v3279_v61, %v3279_v61 }
 0xc92   : > { %v3281_v63 = vsel %vm842_vm3, %v3280_v62, 0.0 }
 0xc93   : > { %3282 = vadd.xlane.f32.xlu0 %v3281_v63 }
 0xd20   : > { %v3283_v26 = vpop.xlane.xlu0 %3282 }
 0xd21   : > { %v3284_v2 = vmul.f32 0.03125, %v3283_v26 }
 0xd23   : > { %v3285_v55 = vadd.f32 1e-05, %v3284_v2 }
 0xd25   : > { %4307 = vrsqrt.f32 %v3285_v55 }
 0xd2f   : > { %v4308_v38 = vpop.eup %4307 }
 0xd30   : > { %v3287_v56 = vmul.f32 %v4308_v38, %v3279_v61 }
 0xd32   : > { %v3295_v4 = vmul.f32 %v3549_v27, %v3287_v56 }
 0xd34   : > { %v3303_v46 = vadd.f32 %v3550_v3, %v3295_v4 }
 0xd36   : > { %3304 = vst.msk [vmem:[%s742_s20] sm:$0xff] %vm842_vm3, %v3303_v46 }
 0xd37 PF: > { %s26_s21 = sadd.s32 1, %s4315_s21  }
 0xd38   : > { %p23_p4 = scmp.ge.s32.totalorder %s26_s21, 5  }
 0xd3a   :  { %25 = sbr.rel (!%p23_p4) target bundleno = 2 (0x2), region = 156 }

</bundles_post_ra>
